<compile_context>
chip_gen: v7x
topology: tpu7x:2x2x1
jax: 0.10.0
libtpu: 0.0.40
codegen_flags: <defaults>
</compile_context>

<pallas_src>
import jax
import jax.numpy as jnp
from jax.experimental import pallas as pl

# ---- synthetic mini-BERT config (consistent with the module's forward) -------
VOCAB = 64
SEQ = 8
HIDDEN = 32          # opt.embed_dim == bert hidden size
N_HEADS = 4
HEAD_DIM = HIDDEN // N_HEADS
INTER = 64           # BERT intermediate size
POLARITIES = 3       # opt.polarities_dim
BATCH = 2
LN_EPS = 1e-12

LANE = 128           # TPU lane width; every last dim is zero-padded to this

# ---- packed-parameter slab layouts -------------------------------------------
# weight slab (bf16, rows x 128): contraction dim along rows (real widths only)
R_QKV = 0                          # (32,128): cols 0:32 Wq | 32:64 Wk | 64:96 Wv
R_WO = R_QKV + HIDDEN              # (32,128): cols 0:32 real
R_W1 = R_WO + HIDDEN               # (32,128): cols 0:64 real
R_W2 = R_W1 + HIDDEN               # (64,128): cols 0:32 real
R_PW = R_W2 + INTER                # (32,128): pooler dense
R_DW = R_PW + HIDDEN               # (32,128): classifier dense (cols 0:3 real)
W_ROWS = R_DW + HIDDEN             # 224

# bias / LayerNorm slab (f32, 16 x 128): one row each
B_EMB_G, B_EMB_B = 0, 1
B_QKV, B_O = 2, 3
B_LN1G, B_LN1B = 4, 5
B_1, B_2 = 6, 7
B_LN2G, B_LN2B = 8, 9
B_PLR, B_DNS = 10, 11
B_ROWS = 16

# embedding slab (f32, 80 x 128)
E_WORD = 0
E_POS = VOCAB
E_TYPE = VOCAB + SEQ
E_ROWS = 80


# ---------------------------------------------------------------------------
# In-kernel helpers
# ---------------------------------------------------------------------------
def _erf_f32(x):
    # Abramowitz & Stegun 7.1.26 (|err| < 1.5e-7). The divide is routed to the
    # EUP via approx reciprocal (adds ~1e-4 rel error, fine for inference).
    a1, a2, a3, a4, a5 = (0.254829592, -0.284496736, 1.421413741,
                          -1.453152027, 1.061405429)
    p = 0.3275911
    z = jnp.abs(x)
    t = pl.reciprocal(1.0 + p * z, approx=True)
    poly = ((((a5 * t + a4) * t + a3) * t + a2) * t + a1) * t
    e = 1.0 - poly * jnp.exp(-z * z)
    return jnp.where(x >= 0, e, -e)


def _gelu_exact(x):
    # HuggingFace/PyTorch BERT uses the exact erf GELU, not the tanh approximation.
    return 0.5 * x * (1.0 + _erf_f32(x * 0.7071067811865475))


# ---------------------------------------------------------------------------
# Single fused kernel (grid-less, everything resident in VMEM):
#   in-kernel embedding lookup -> embeddings LayerNorm -> 1 BERT encoder layer
#   -> BertPooler -> dropout(eval)=identity -> classifier Linear.
# ---------------------------------------------------------------------------
def bert_spc_kernel(ids_ref, emb_ref, w_ref, b_ref, out_ref):
    rows = ids_ref.shape[0]          # B * SEQ   (static)
    n_b = rows // SEQ                # batch size (static)

    lane_id = jax.lax.broadcasted_iota(jnp.int32, (1, LANE), 1)
    h_mask = (lane_id < HIDDEN).astype(jnp.float32)

    def brow(r):                     # one (1,128) bias/LN row, static slice = cheap
        return b_ref[r:r + 1, :]

    def layer_norm(v, g, b):
        # masked LN: stats over the HIDDEN real lanes; mask enforces the
        # zero-padding invariant even if an upstream op perturbs padded lanes.
        v = v * h_mask
        mean = jnp.sum(v, axis=-1, keepdims=True) * (1.0 / HIDDEN)
        d = (v - mean) * h_mask
        var = jnp.sum(d * d, axis=-1, keepdims=True) * (1.0 / HIDDEN)
        return d * jax.lax.rsqrt(var + LN_EPS) * g + b

    def mm(a, w_bf16):               # bf16 MXU matmul, f32 accumulation
        return jnp.dot(a.astype(jnp.bfloat16), w_bf16,
                       preferred_element_type=jnp.float32)

    # ---- embeddings: gather-as-matmul (one-hot @ word_emb) + pos + type ------
    ids = ids_ref[...]                                           # (rows, 1) i32
    vocab_iota = jax.lax.broadcasted_iota(jnp.int32, (rows, VOCAB), 1)
    onehot = (ids == vocab_iota).astype(jnp.float32)             # (rows, VOCAB)
    x = jnp.dot(onehot, emb_ref[E_WORD:E_WORD + VOCAB, :],
                preferred_element_type=jnp.float32)              # exact row select
    pos = emb_ref[E_POS:E_POS + SEQ, :]                          # (SEQ, 128)
    x = x + jnp.concatenate([pos] * n_b, axis=0) + emb_ref[E_TYPE:E_TYPE + 1, :]

    # BERT embeddings LayerNorm
    x = layer_norm(x, brow(B_EMB_G), brow(B_EMB_B))

    # ---- self-attention: fused QKV projection, heads batched on leading axis --
    qkv = mm(x[:, :HIDDEN], w_ref[R_QKV:R_QKV + HIDDEN, :]) + brow(B_QKV)

    def split_heads(off):            # lanes [off, off+32) -> (N_HEADS*B, S, HEAD_DIM)
        return jnp.concatenate(
            [qkv[:, off + h * HEAD_DIM: off + (h + 1) * HEAD_DIM]
             .reshape(n_b, SEQ, HEAD_DIM) for h in range(N_HEADS)], axis=0)

    qh, kh, vh = split_heads(0), split_heads(HIDDEN), split_heads(2 * HIDDEN)

    s = jnp.einsum('bqd,bkd->bqk',
                   qh.astype(jnp.bfloat16), kh.astype(jnp.bfloat16),
                   preferred_element_type=jnp.float32) * (1.0 / HEAD_DIM ** 0.5)
    # TODO(synk): no attention_mask applied; real padded inputs need the mask
    #             added to `s` before the softmax.
    s = s - jnp.max(s, axis=-1, keepdims=True)
    p = jnp.exp(s)
    p = p * pl.reciprocal(jnp.sum(p, axis=-1, keepdims=True), approx=True)
    ctx = jnp.einsum('bqk,bkd->bqd',
                     p.astype(jnp.bfloat16), vh.astype(jnp.bfloat16),
                     preferred_element_type=jnp.float32)

    # (N_HEADS*B, S, HEAD_DIM) -> (B*S, HIDDEN), head-major lanes as in BERT
    ctx = jnp.concatenate([ctx[h * n_b:(h + 1) * n_b] for h in range(N_HEADS)],
                          axis=-1).reshape(rows, HIDDEN)

    attn = mm(ctx, w_ref[R_WO:R_WO + HIDDEN, :]) + brow(B_O)
    x = layer_norm(x + attn, brow(B_LN1G), brow(B_LN1B))

    # ---- feed-forward ---------------------------------------------------------
    h1 = mm(x[:, :HIDDEN], w_ref[R_W1:R_W1 + HIDDEN, :]) + brow(B_1)
    h1 = _gelu_exact(h1)
    h2 = mm(h1[:, :INTER], w_ref[R_W2:R_W2 + INTER, :]) + brow(B_2)
    y = layer_norm(x + h2, brow(B_LN2G), brow(B_LN2B))   # last_hidden_state

    # ---- BertPooler (CLS token -> Linear -> tanh), dropout(eval)=id, classifier
    first = y.reshape(n_b, SEQ, LANE)[:, 0:1, :].reshape(n_b, LANE)
    pooled = jnp.tanh(mm(first[:, :HIDDEN], w_ref[R_PW:R_PW + HIDDEN, :])
                      + brow(B_PLR))
    logits = mm(pooled[:, :HIDDEN], w_ref[R_DW:R_DW + HIDDEN, :]) + brow(B_DNS)

    # ---- single dense output slab: rows [0:B)=logits, [B:2B)=pooled, rest 0 ---
    pad_rows = out_ref.shape[0] - 2 * n_b
    pieces = [logits, pooled]
    if pad_rows > 0:
        pieces.append(jnp.zeros((pad_rows, LANE), jnp.float32))
    out_ref[...] = jnp.concatenate(pieces, axis=0)


# ---------------------------------------------------------------------------
# Parameters (deterministic, synthetic), packed into 3 slabs
# ---------------------------------------------------------------------------
def _pad_cols(a):
    return jnp.pad(a, ((0, 0), (0, LANE - a.shape[1])))


def init_params(key):
    ks = iter(jax.random.split(key, 11))

    def n(shape):
        return jax.random.normal(next(ks), shape, jnp.float32) * 0.02

    word, pos, typ = n((VOCAB, HIDDEN)), n((SEQ, HIDDEN)), n((1, HIDDEN))
    wq, wk, wv = n((HIDDEN, HIDDEN)), n((HIDDEN, HIDDEN)), n((HIDDEN, HIDDEN))
    wo = n((HIDDEN, HIDDEN))
    w1, w2 = n((HIDDEN, INTER)), n((INTER, HIDDEN))
    pw, dw = n((HIDDEN, HIDDEN)), n((HIDDEN, POLARITIES))

    # weight slab (bf16): contraction dims along rows, real widths only
    wqkv = jnp.concatenate([wq, wk, wv], axis=1)          # (32, 96)
    w_slab = jnp.concatenate(
        [_pad_cols(wqkv), _pad_cols(wo), _pad_cols(w1),
         _pad_cols(w2), _pad_cols(pw), _pad_cols(dw)], axis=0
    ).astype(jnp.bfloat16)                                # (224, 128)
    assert w_slab.shape == (W_ROWS, LANE)

    # bias / LayerNorm slab (f32): gammas = 1 over real lanes, everything else 0
    ones_h = _pad_cols(jnp.ones((1, HIDDEN), jnp.float32))
    zrow = jnp.zeros((1, LANE), jnp.float32)
    b_rows = [zrow] * B_ROWS
    b_rows[B_EMB_G] = ones_h
    b_rows[B_LN1G] = ones_h
    b_rows[B_LN2G] = ones_h
    b_slab = jnp.concatenate(b_rows, axis=0)              # (16, 128)

    # embedding slab (f32): word (64) | pos (8) | token-type-0 (1) | pad
    emb_slab = jnp.concatenate(
        [_pad_cols(word), _pad_cols(pos), _pad_cols(typ),
         jnp.zeros((E_ROWS - E_TYPE - 1, LANE), jnp.float32)], axis=0)  # (80, 128)

    return {'emb_slab': emb_slab, 'w_slab': w_slab, 'b_slab': b_slab}


@jax.jit
def bert_spc_forward(text_bert_indices, params):
    B, S = text_bert_indices.shape
    assert S == SEQ
    ids = text_bert_indices.reshape(B * S, 1).astype(jnp.int32)
    out_rows = max(8, ((2 * B + 7) // 8) * 8)             # sublane-dense output slab

    out = pl.pallas_call(
        bert_spc_kernel,
        out_shape=jax.ShapeDtypeStruct((out_rows, LANE), jnp.float32),
    )(ids, params['emb_slab'], params['w_slab'], params['b_slab'])

    # slice the real rows / columns back out of the dense (out_rows,128) slab
    return {'logits': out[:B, :POLARITIES],
            'hidden_state': out[B:2 * B, :HIDDEN]}


if __name__ == "__main__":
    key = jax.random.PRNGKey(0)
    k_ids, k_params = jax.random.split(key)
    text_bert_indices = jax.random.randint(k_ids, (BATCH, SEQ), 0, VOCAB,
                                           dtype=jnp.int32)
    params = init_params(k_params)

    out = bert_spc_forward(text_bert_indices, params)
    jax.block_until_ready(out)

    assert out['logits'].shape == (BATCH, POLARITIES)
    assert out['hidden_state'].shape == (BATCH, HIDDEN)
    print("KERNEL_OK")
</pallas_src>

<mosaic_0001>
module attributes {stable_mosaic.version = 11 : i64} {
  func.func @bert_spc_kernel(%arg0: memref<16x1xi32, #tpu.memory_space<vmem>>, %arg1: memref<80x128xf32, #tpu.memory_space<vmem>>, %arg2: memref<224x128xbf16, #tpu.memory_space<vmem>>, %arg3: memref<16x128xf32, #tpu.memory_space<vmem>>, %arg4: memref<8x128xf32, #tpu.memory_space<vmem>>) attributes {dimension_semantics = [], scalar_prefetch = 0 : i64, scratch_operands = 0 : i64, tpu.core_type = #tpu.core_type<tc>} {
    %0 = tpu.iota {dimensions = array<i32: 1>} : vector<1x128xi32>
    %c32_i32 = arith.constant 32 : i32
    %1 = vector.broadcast %c32_i32 : i32 to vector<1x128xi32>
    %2 = arith.cmpi slt, %0, %1 : vector<1x128xi32>
    %3 = arith.extui %2 : vector<1x128xi1> to vector<1x128xi32>
    %4 = arith.sitofp %3 : vector<1x128xi32> to vector<1x128xf32>
    %c0 = arith.constant 0 : index
    %c0_0 = arith.constant 0 : index
    %5 = vector.load %arg0[%c0, %c0_0] : memref<16x1xi32, #tpu.memory_space<vmem>>, vector<16x1xi32>
    %6 = tpu.iota {dimensions = array<i32: 1>} : vector<16x64xi32>
    %7 = vector.broadcast %5 : vector<16x1xi32> to vector<16x64xi32>
    %8 = arith.cmpi eq, %7, %6 : vector<16x64xi32>
    %9 = arith.extui %8 : vector<16x64xi1> to vector<16x64xi32>
    %10 = arith.sitofp %9 : vector<16x64xi32> to vector<16x64xf32>
    %c0_1 = arith.constant 0 : index
    %c0_2 = arith.constant 0 : index
    %11 = vector.load %arg1[%c0_1, %c0_2] : memref<80x128xf32, #tpu.memory_space<vmem>>, vector<64x128xf32>
    %cst = arith.constant dense<0.000000e+00> : vector<16x128xf32>
    %12 = tpu.matmul %10, %11, %cst {dimension_numbers = #tpu.dot_dimension_numbers<[1], [0], [0], [1], [0, 0, 1, 1], [], []>} : vector<16x64xf32>, vector<64x128xf32>, vector<16x128xf32> -> vector<16x128xf32>
    %c64 = arith.constant 64 : index
    %c0_3 = arith.constant 0 : index
    %13 = vector.load %arg1[%c64, %c0_3] : memref<80x128xf32, #tpu.memory_space<vmem>>, vector<8x128xf32>
    %14 = tpu.concatenate %13, %13 in 0 : vector<8x128xf32>, vector<8x128xf32> -> vector<16x128xf32>
    %15 = arith.addf %12, %14 : vector<16x128xf32>
    %c72 = arith.constant 72 : index
    %c0_4 = arith.constant 0 : index
    %16 = vector.load %arg1[%c72, %c0_4] : memref<80x128xf32, #tpu.memory_space<vmem>>, vector<1x128xf32>
    %17 = vector.broadcast %16 : vector<1x128xf32> to vector<16x128xf32>
    %18 = arith.addf %15, %17 : vector<16x128xf32>
    %c0_5 = arith.constant 0 : index
    %c0_6 = arith.constant 0 : index
    %19 = vector.load %arg3[%c0_5, %c0_6] : memref<16x128xf32, #tpu.memory_space<vmem>>, vector<1x128xf32>
    %c1 = arith.constant 1 : index
    %c0_7 = arith.constant 0 : index
    %20 = vector.load %arg3[%c1, %c0_7] : memref<16x128xf32, #tpu.memory_space<vmem>>, vector<1x128xf32>
    %21 = vector.broadcast %4 : vector<1x128xf32> to vector<16x128xf32>
    %22 = arith.mulf %18, %21 : vector<16x128xf32>
    %cst_8 = arith.constant dense<0.000000e+00> : vector<16xf32>
    %23 = vector.multi_reduction <add>, %22, %cst_8 [1] : vector<16x128xf32> to vector<16xf32>
    %24 = vector.shape_cast %23 : vector<16xf32> to vector<16x1xf32>
    %cst_9 = arith.constant 3.125000e-02 : f32
    %25 = vector.broadcast %cst_9 : f32 to vector<16x1xf32>
    %26 = arith.mulf %24, %25 : vector<16x1xf32>
    %27 = vector.broadcast %26 : vector<16x1xf32> to vector<16x128xf32>
    %28 = arith.subf %22, %27 : vector<16x128xf32>
    %29 = vector.broadcast %4 : vector<1x128xf32> to vector<16x128xf32>
    %30 = arith.mulf %28, %29 : vector<16x128xf32>
    %31 = arith.mulf %30, %30 : vector<16x128xf32>
    %cst_10 = arith.constant dense<0.000000e+00> : vector<16xf32>
    %32 = vector.multi_reduction <add>, %31, %cst_10 [1] : vector<16x128xf32> to vector<16xf32>
    %33 = vector.shape_cast %32 : vector<16xf32> to vector<16x1xf32>
    %cst_11 = arith.constant 3.125000e-02 : f32
    %34 = vector.broadcast %cst_11 : f32 to vector<16x1xf32>
    %35 = arith.mulf %33, %34 : vector<16x1xf32>
    %cst_12 = arith.constant 9.99999996E-13 : f32
    %36 = vector.broadcast %cst_12 : f32 to vector<16x1xf32>
    %37 = arith.addf %35, %36 : vector<16x1xf32>
    %38 = math.rsqrt %37 : vector<16x1xf32>
    %39 = vector.broadcast %38 : vector<16x1xf32> to vector<16x128xf32>
    %40 = arith.mulf %30, %39 : vector<16x128xf32>
    %41 = vector.broadcast %19 : vector<1x128xf32> to vector<16x128xf32>
    %42 = arith.mulf %40, %41 : vector<16x128xf32>
    %43 = vector.broadcast %20 : vector<1x128xf32> to vector<16x128xf32>
    %44 = arith.addf %42, %43 : vector<16x128xf32>
    %45 = vector.extract_strided_slice %44 {offsets = [0, 0], sizes = [16, 32], strides = [1, 1]} : vector<16x128xf32> to vector<16x32xf32>
    %c0_13 = arith.constant 0 : index
    %c0_14 = arith.constant 0 : index
    %46 = vector.load %arg2[%c0_13, %c0_14] : memref<224x128xbf16, #tpu.memory_space<vmem>>, vector<32x128xbf16>
    %47 = arith.truncf %45 : vector<16x32xf32> to vector<16x32xbf16>
    %cst_15 = arith.constant dense<0.000000e+00> : vector<16x128xf32>
    %48 = tpu.matmul %47, %46, %cst_15 {dimension_numbers = #tpu.dot_dimension_numbers<[1], [0], [0], [1], [0, 0, 1, 1], [], []>} : vector<16x32xbf16>, vector<32x128xbf16>, vector<16x128xf32> -> vector<16x128xf32>
    %c2 = arith.constant 2 : index
    %c0_16 = arith.constant 0 : index
    %49 = vector.load %arg3[%c2, %c0_16] : memref<16x128xf32, #tpu.memory_space<vmem>>, vector<1x128xf32>
    %50 = vector.broadcast %49 : vector<1x128xf32> to vector<16x128xf32>
    %51 = arith.addf %48, %50 : vector<16x128xf32>
    %52 = vector.extract_strided_slice %51 {offsets = [0, 0], sizes = [16, 8], strides = [1, 1]} : vector<16x128xf32> to vector<16x8xf32>
    %53 = vector.shape_cast %52 : vector<16x8xf32> to vector<2x8x8xf32>
    %54 = vector.extract_strided_slice %51 {offsets = [0, 8], sizes = [16, 8], strides = [1, 1]} : vector<16x128xf32> to vector<16x8xf32>
    %55 = vector.shape_cast %54 : vector<16x8xf32> to vector<2x8x8xf32>
    %56 = vector.extract_strided_slice %51 {offsets = [0, 16], sizes = [16, 8], strides = [1, 1]} : vector<16x128xf32> to vector<16x8xf32>
    %57 = vector.shape_cast %56 : vector<16x8xf32> to vector<2x8x8xf32>
    %58 = vector.extract_strided_slice %51 {offsets = [0, 24], sizes = [16, 8], strides = [1, 1]} : vector<16x128xf32> to vector<16x8xf32>
    %59 = vector.shape_cast %58 : vector<16x8xf32> to vector<2x8x8xf32>
    %60 = tpu.concatenate %53, %55, %57, %59 in 0 : vector<2x8x8xf32>, vector<2x8x8xf32>, vector<2x8x8xf32>, vector<2x8x8xf32> -> vector<8x8x8xf32>
    %61 = vector.extract_strided_slice %51 {offsets = [0, 32], sizes = [16, 8], strides = [1, 1]} : vector<16x128xf32> to vector<16x8xf32>
    %62 = vector.shape_cast %61 : vector<16x8xf32> to vector<2x8x8xf32>
    %63 = vector.extract_strided_slice %51 {offsets = [0, 40], sizes = [16, 8], strides = [1, 1]} : vector<16x128xf32> to vector<16x8xf32>
    %64 = vector.shape_cast %63 : vector<16x8xf32> to vector<2x8x8xf32>
    %65 = vector.extract_strided_slice %51 {offsets = [0, 48], sizes = [16, 8], strides = [1, 1]} : vector<16x128xf32> to vector<16x8xf32>
    %66 = vector.shape_cast %65 : vector<16x8xf32> to vector<2x8x8xf32>
    %67 = vector.extract_strided_slice %51 {offsets = [0, 56], sizes = [16, 8], strides = [1, 1]} : vector<16x128xf32> to vector<16x8xf32>
    %68 = vector.shape_cast %67 : vector<16x8xf32> to vector<2x8x8xf32>
    %69 = tpu.concatenate %62, %64, %66, %68 in 0 : vector<2x8x8xf32>, vector<2x8x8xf32>, vector<2x8x8xf32>, vector<2x8x8xf32> -> vector<8x8x8xf32>
    %70 = vector.extract_strided_slice %51 {offsets = [0, 64], sizes = [16, 8], strides = [1, 1]} : vector<16x128xf32> to vector<16x8xf32>
    %71 = vector.shape_cast %70 : vector<16x8xf32> to vector<2x8x8xf32>
    %72 = vector.extract_strided_slice %51 {offsets = [0, 72], sizes = [16, 8], strides = [1, 1]} : vector<16x128xf32> to vector<16x8xf32>
    %73 = vector.shape_cast %72 : vector<16x8xf32> to vector<2x8x8xf32>
    %74 = vector.extract_strided_slice %51 {offsets = [0, 80], sizes = [16, 8], strides = [1, 1]} : vector<16x128xf32> to vector<16x8xf32>
    %75 = vector.shape_cast %74 : vector<16x8xf32> to vector<2x8x8xf32>
    %76 = vector.extract_strided_slice %51 {offsets = [0, 88], sizes = [16, 8], strides = [1, 1]} : vector<16x128xf32> to vector<16x8xf32>
    %77 = vector.shape_cast %76 : vector<16x8xf32> to vector<2x8x8xf32>
    %78 = tpu.concatenate %71, %73, %75, %77 in 0 : vector<2x8x8xf32>, vector<2x8x8xf32>, vector<2x8x8xf32>, vector<2x8x8xf32> -> vector<8x8x8xf32>
    %79 = arith.truncf %60 : vector<8x8x8xf32> to vector<8x8x8xbf16>
    %80 = arith.truncf %69 : vector<8x8x8xf32> to vector<8x8x8xbf16>
    "tpu.trace_start"() <{level = 10 : i32, message = "bqd,bkd->bqk"}> : () -> ()
    %cst_17 = arith.constant dense<0.000000e+00> : vector<8x8x8xf32>
    %81 = tpu.matmul %79, %80, %cst_17 {dimension_numbers = #tpu.dot_dimension_numbers<[2], [2], [1], [1], [0, 0, 0, 1, 1, 1], [0], [0]>} : vector<8x8x8xbf16>, vector<8x8x8xbf16>, vector<8x8x8xf32> -> vector<8x8x8xf32>
    "tpu.trace_stop"() : () -> ()
    %cst_18 = arith.constant 0.353553385 : f32
    %82 = vector.broadcast %cst_18 : f32 to vector<8x8x8xf32>
    %83 = arith.mulf %81, %82 : vector<8x8x8xf32>
    %cst_19 = arith.constant dense<0xFF800000> : vector<8x8xf32>
    %84 = vector.multi_reduction <maximumf>, %83, %cst_19 [2] : vector<8x8x8xf32> to vector<8x8xf32>
    %85 = vector.shape_cast %84 : vector<8x8xf32> to vector<8x8x1xf32>
    %86 = vector.broadcast %85 : vector<8x8x1xf32> to vector<8x8x8xf32>
    %87 = arith.subf %83, %86 : vector<8x8x8xf32>
    %88 = math.exp %87 : vector<8x8x8xf32>
    %cst_20 = arith.constant dense<0.000000e+00> : vector<8x8xf32>
    %89 = vector.multi_reduction <add>, %88, %cst_20 [2] : vector<8x8x8xf32> to vector<8x8xf32>
    %90 = vector.shape_cast %89 : vector<8x8xf32> to vector<8x8x1xf32>
    %91 = tpu.reciprocal %90 {approx = true} : vector<8x8x1xf32> -> vector<8x8x1xf32>
    %92 = vector.broadcast %91 : vector<8x8x1xf32> to vector<8x8x8xf32>
    %93 = arith.mulf %88, %92 : vector<8x8x8xf32>
    %94 = arith.truncf %93 : vector<8x8x8xf32> to vector<8x8x8xbf16>
    %95 = arith.truncf %78 : vector<8x8x8xf32> to vector<8x8x8xbf16>
    "tpu.trace_start"() <{level = 10 : i32, message = "bqk,bkd->bqd"}> : () -> ()
    %cst_21 = arith.constant dense<0.000000e+00> : vector<8x8x8xf32>
    %96 = tpu.matmul %94, %95, %cst_21 {dimension_numbers = #tpu.dot_dimension_numbers<[2], [1], [1], [2], [0, 0, 0, 1, 1, 2], [0], [0]>} : vector<8x8x8xbf16>, vector<8x8x8xbf16>, vector<8x8x8xf32> -> vector<8x8x8xf32>
    "tpu.trace_stop"() : () -> ()
    %97 = vector.extract_strided_slice %96 {offsets = [0, 0, 0], sizes = [2, 8, 8], strides = [1, 1, 1]} : vector<8x8x8xf32> to vector<2x8x8xf32>
    %98 = vector.extract_strided_slice %96 {offsets = [2, 0, 0], sizes = [2, 8, 8], strides = [1, 1, 1]} : vector<8x8x8xf32> to vector<2x8x8xf32>
    %99 = vector.extract_strided_slice %96 {offsets = [4, 0, 0], sizes = [2, 8, 8], strides = [1, 1, 1]} : vector<8x8x8xf32> to vector<2x8x8xf32>
    %100 = vector.extract_strided_slice %96 {offsets = [6, 0, 0], sizes = [2, 8, 8], strides = [1, 1, 1]} : vector<8x8x8xf32> to vector<2x8x8xf32>
    %101 = tpu.concatenate %97, %98, %99, %100 in 2 : vector<2x8x8xf32>, vector<2x8x8xf32>, vector<2x8x8xf32>, vector<2x8x8xf32> -> vector<2x8x32xf32>
    %102 = vector.shape_cast %101 : vector<2x8x32xf32> to vector<16x32xf32>
    %c32 = arith.constant 32 : index
    %c0_22 = arith.constant 0 : index
    %103 = vector.load %arg2[%c32, %c0_22] : memref<224x128xbf16, #tpu.memory_space<vmem>>, vector<32x128xbf16>
    %104 = arith.truncf %102 : vector<16x32xf32> to vector<16x32xbf16>
    %cst_23 = arith.constant dense<0.000000e+00> : vector<16x128xf32>
    %105 = tpu.matmul %104, %103, %cst_23 {dimension_numbers = #tpu.dot_dimension_numbers<[1], [0], [0], [1], [0, 0, 1, 1], [], []>} : vector<16x32xbf16>, vector<32x128xbf16>, vector<16x128xf32> -> vector<16x128xf32>
    %c3 = arith.constant 3 : index
    %c0_24 = arith.constant 0 : index
    %106 = vector.load %arg3[%c3, %c0_24] : memref<16x128xf32, #tpu.memory_space<vmem>>, vector<1x128xf32>
    %107 = vector.broadcast %106 : vector<1x128xf32> to vector<16x128xf32>
    %108 = arith.addf %105, %107 : vector<16x128xf32>
    %109 = arith.addf %44, %108 : vector<16x128xf32>
    %c4 = arith.constant 4 : index
    %c0_25 = arith.constant 0 : index
    %110 = vector.load %arg3[%c4, %c0_25] : memref<16x128xf32, #tpu.memory_space<vmem>>, vector<1x128xf32>
    %c5 = arith.constant 5 : index
    %c0_26 = arith.constant 0 : index
    %111 = vector.load %arg3[%c5, %c0_26] : memref<16x128xf32, #tpu.memory_space<vmem>>, vector<1x128xf32>
    %112 = vector.broadcast %4 : vector<1x128xf32> to vector<16x128xf32>
    %113 = arith.mulf %109, %112 : vector<16x128xf32>
    %cst_27 = arith.constant dense<0.000000e+00> : vector<16xf32>
    %114 = vector.multi_reduction <add>, %113, %cst_27 [1] : vector<16x128xf32> to vector<16xf32>
    %115 = vector.shape_cast %114 : vector<16xf32> to vector<16x1xf32>
    %cst_28 = arith.constant 3.125000e-02 : f32
    %116 = vector.broadcast %cst_28 : f32 to vector<16x1xf32>
    %117 = arith.mulf %115, %116 : vector<16x1xf32>
    %118 = vector.broadcast %117 : vector<16x1xf32> to vector<16x128xf32>
    %119 = arith.subf %113, %118 : vector<16x128xf32>
    %120 = vector.broadcast %4 : vector<1x128xf32> to vector<16x128xf32>
    %121 = arith.mulf %119, %120 : vector<16x128xf32>
    %122 = arith.mulf %121, %121 : vector<16x128xf32>
    %cst_29 = arith.constant dense<0.000000e+00> : vector<16xf32>
    %123 = vector.multi_reduction <add>, %122, %cst_29 [1] : vector<16x128xf32> to vector<16xf32>
    %124 = vector.shape_cast %123 : vector<16xf32> to vector<16x1xf32>
    %cst_30 = arith.constant 3.125000e-02 : f32
    %125 = vector.broadcast %cst_30 : f32 to vector<16x1xf32>
    %126 = arith.mulf %124, %125 : vector<16x1xf32>
    %cst_31 = arith.constant 9.99999996E-13 : f32
    %127 = vector.broadcast %cst_31 : f32 to vector<16x1xf32>
    %128 = arith.addf %126, %127 : vector<16x1xf32>
    %129 = math.rsqrt %128 : vector<16x1xf32>
    %130 = vector.broadcast %129 : vector<16x1xf32> to vector<16x128xf32>
    %131 = arith.mulf %121, %130 : vector<16x128xf32>
    %132 = vector.broadcast %110 : vector<1x128xf32> to vector<16x128xf32>
    %133 = arith.mulf %131, %132 : vector<16x128xf32>
    %134 = vector.broadcast %111 : vector<1x128xf32> to vector<16x128xf32>
    %135 = arith.addf %133, %134 : vector<16x128xf32>
    %136 = vector.extract_strided_slice %135 {offsets = [0, 0], sizes = [16, 32], strides = [1, 1]} : vector<16x128xf32> to vector<16x32xf32>
    %c64_32 = arith.constant 64 : index
    %c0_33 = arith.constant 0 : index
    %137 = vector.load %arg2[%c64_32, %c0_33] : memref<224x128xbf16, #tpu.memory_space<vmem>>, vector<32x128xbf16>
    %138 = arith.truncf %136 : vector<16x32xf32> to vector<16x32xbf16>
    %cst_34 = arith.constant dense<0.000000e+00> : vector<16x128xf32>
    %139 = tpu.matmul %138, %137, %cst_34 {dimension_numbers = #tpu.dot_dimension_numbers<[1], [0], [0], [1], [0, 0, 1, 1], [], []>} : vector<16x32xbf16>, vector<32x128xbf16>, vector<16x128xf32> -> vector<16x128xf32>
    %c6 = arith.constant 6 : index
    %c0_35 = arith.constant 0 : index
    %140 = vector.load %arg3[%c6, %c0_35] : memref<16x128xf32, #tpu.memory_space<vmem>>, vector<1x128xf32>
    %141 = vector.broadcast %140 : vector<1x128xf32> to vector<16x128xf32>
    %142 = arith.addf %139, %141 : vector<16x128xf32>
    %cst_36 = arith.constant 5.000000e-01 : f32
    %143 = vector.broadcast %cst_36 : f32 to vector<16x128xf32>
    %144 = arith.mulf %143, %142 : vector<16x128xf32>
    %cst_37 = arith.constant 0.707106769 : f32
    %145 = vector.broadcast %cst_37 : f32 to vector<16x128xf32>
    %146 = arith.mulf %142, %145 : vector<16x128xf32>
    %147 = math.absf %146 : vector<16x128xf32>
    %cst_38 = arith.constant 0.327591091 : f32
    %148 = vector.broadcast %cst_38 : f32 to vector<16x128xf32>
    %149 = arith.mulf %148, %147 : vector<16x128xf32>
    %cst_39 = arith.constant 1.000000e+00 : f32
    %150 = vector.broadcast %cst_39 : f32 to vector<16x128xf32>
    %151 = arith.addf %150, %149 : vector<16x128xf32>
    %152 = tpu.reciprocal %151 {approx = true} : vector<16x128xf32> -> vector<16x128xf32>
    %cst_40 = arith.constant 1.06140542 : f32
    %153 = vector.broadcast %cst_40 : f32 to vector<16x128xf32>
    %154 = arith.mulf %153, %152 : vector<16x128xf32>
    %cst_41 = arith.constant -1.45315206 : f32
    %155 = vector.broadcast %cst_41 : f32 to vector<16x128xf32>
    %156 = arith.addf %154, %155 : vector<16x128xf32>
    %157 = arith.mulf %156, %152 : vector<16x128xf32>
    %cst_42 = arith.constant 1.42141378 : f32
    %158 = vector.broadcast %cst_42 : f32 to vector<16x128xf32>
    %159 = arith.addf %157, %158 : vector<16x128xf32>
    %160 = arith.mulf %159, %152 : vector<16x128xf32>
    %cst_43 = arith.constant -0.284496725 : f32
    %161 = vector.broadcast %cst_43 : f32 to vector<16x128xf32>
    %162 = arith.addf %160, %161 : vector<16x128xf32>
    %163 = arith.mulf %162, %152 : vector<16x128xf32>
    %cst_44 = arith.constant 0.254829586 : f32
    %164 = vector.broadcast %cst_44 : f32 to vector<16x128xf32>
    %165 = arith.addf %163, %164 : vector<16x128xf32>
    %166 = arith.mulf %165, %152 : vector<16x128xf32>
    %cst_45 = arith.constant 0.000000e+00 : f32
    %167 = vector.broadcast %cst_45 : f32 to vector<16x128xf32>
    %168 = arith.subf %167, %147 : vector<16x128xf32>
    %169 = arith.mulf %168, %147 : vector<16x128xf32>
    %170 = math.exp %169 : vector<16x128xf32>
    %171 = arith.mulf %166, %170 : vector<16x128xf32>
    %cst_46 = arith.constant 1.000000e+00 : f32
    %172 = vector.broadcast %cst_46 : f32 to vector<16x128xf32>
    %173 = arith.subf %172, %171 : vector<16x128xf32>
    %cst_47 = arith.constant 0.000000e+00 : f32
    %174 = vector.broadcast %cst_47 : f32 to vector<16x128xf32>
    %175 = arith.cmpf oge, %146, %174 : vector<16x128xf32>
    %cst_48 = arith.constant 0.000000e+00 : f32
    %176 = vector.broadcast %cst_48 : f32 to vector<16x128xf32>
    %177 = arith.subf %176, %173 : vector<16x128xf32>
    %178 = arith.select %175, %173, %177 : vector<16x128xi1>, vector<16x128xf32>
    %cst_49 = arith.constant 1.000000e+00 : f32
    %179 = vector.broadcast %cst_49 : f32 to vector<16x128xf32>
    %180 = arith.addf %179, %178 : vector<16x128xf32>
    %181 = arith.mulf %144, %180 : vector<16x128xf32>
    %182 = vector.extract_strided_slice %181 {offsets = [0, 0], sizes = [16, 64], strides = [1, 1]} : vector<16x128xf32> to vector<16x64xf32>
    %c96 = arith.constant 96 : index
    %c0_50 = arith.constant 0 : index
    %183 = vector.load %arg2[%c96, %c0_50] : memref<224x128xbf16, #tpu.memory_space<vmem>>, vector<64x128xbf16>
    %184 = arith.truncf %182 : vector<16x64xf32> to vector<16x64xbf16>
    %cst_51 = arith.constant dense<0.000000e+00> : vector<16x128xf32>
    %185 = tpu.matmul %184, %183, %cst_51 {dimension_numbers = #tpu.dot_dimension_numbers<[1], [0], [0], [1], [0, 0, 1, 1], [], []>} : vector<16x64xbf16>, vector<64x128xbf16>, vector<16x128xf32> -> vector<16x128xf32>
    %c7 = arith.constant 7 : index
    %c0_52 = arith.constant 0 : index
    %186 = vector.load %arg3[%c7, %c0_52] : memref<16x128xf32, #tpu.memory_space<vmem>>, vector<1x128xf32>
    %187 = vector.broadcast %186 : vector<1x128xf32> to vector<16x128xf32>
    %188 = arith.addf %185, %187 : vector<16x128xf32>
    %189 = arith.addf %135, %188 : vector<16x128xf32>
    %c8 = arith.constant 8 : index
    %c0_53 = arith.constant 0 : index
    %190 = vector.load %arg3[%c8, %c0_53] : memref<16x128xf32, #tpu.memory_space<vmem>>, vector<1x128xf32>
    %c9 = arith.constant 9 : index
    %c0_54 = arith.constant 0 : index
    %191 = vector.load %arg3[%c9, %c0_54] : memref<16x128xf32, #tpu.memory_space<vmem>>, vector<1x128xf32>
    %192 = vector.broadcast %4 : vector<1x128xf32> to vector<16x128xf32>
    %193 = arith.mulf %189, %192 : vector<16x128xf32>
    %cst_55 = arith.constant dense<0.000000e+00> : vector<16xf32>
    %194 = vector.multi_reduction <add>, %193, %cst_55 [1] : vector<16x128xf32> to vector<16xf32>
    %195 = vector.shape_cast %194 : vector<16xf32> to vector<16x1xf32>
    %cst_56 = arith.constant 3.125000e-02 : f32
    %196 = vector.broadcast %cst_56 : f32 to vector<16x1xf32>
    %197 = arith.mulf %195, %196 : vector<16x1xf32>
    %198 = vector.broadcast %197 : vector<16x1xf32> to vector<16x128xf32>
    %199 = arith.subf %193, %198 : vector<16x128xf32>
    %200 = vector.broadcast %4 : vector<1x128xf32> to vector<16x128xf32>
    %201 = arith.mulf %199, %200 : vector<16x128xf32>
    %202 = arith.mulf %201, %201 : vector<16x128xf32>
    %cst_57 = arith.constant dense<0.000000e+00> : vector<16xf32>
    %203 = vector.multi_reduction <add>, %202, %cst_57 [1] : vector<16x128xf32> to vector<16xf32>
    %204 = vector.shape_cast %203 : vector<16xf32> to vector<16x1xf32>
    %cst_58 = arith.constant 3.125000e-02 : f32
    %205 = vector.broadcast %cst_58 : f32 to vector<16x1xf32>
    %206 = arith.mulf %204, %205 : vector<16x1xf32>
    %cst_59 = arith.constant 9.99999996E-13 : f32
    %207 = vector.broadcast %cst_59 : f32 to vector<16x1xf32>
    %208 = arith.addf %206, %207 : vector<16x1xf32>
    %209 = math.rsqrt %208 : vector<16x1xf32>
    %210 = vector.broadcast %209 : vector<16x1xf32> to vector<16x128xf32>
    %211 = arith.mulf %201, %210 : vector<16x128xf32>
    %212 = vector.broadcast %190 : vector<1x128xf32> to vector<16x128xf32>
    %213 = arith.mulf %211, %212 : vector<16x128xf32>
    %214 = vector.broadcast %191 : vector<1x128xf32> to vector<16x128xf32>
    %215 = arith.addf %213, %214 : vector<16x128xf32>
    %216 = vector.shape_cast %215 : vector<16x128xf32> to vector<2x8x128xf32>
    %217 = vector.extract_strided_slice %216 {offsets = [0, 0, 0], sizes = [2, 1, 128], strides = [1, 1, 1]} : vector<2x8x128xf32> to vector<2x1x128xf32>
    %218 = vector.shape_cast %217 : vector<2x1x128xf32> to vector<2x128xf32>
    %219 = vector.extract_strided_slice %218 {offsets = [0, 0], sizes = [2, 32], strides = [1, 1]} : vector<2x128xf32> to vector<2x32xf32>
    %c160 = arith.constant 160 : index
    %c0_60 = arith.constant 0 : index
    %220 = vector.load %arg2[%c160, %c0_60] : memref<224x128xbf16, #tpu.memory_space<vmem>>, vector<32x128xbf16>
    %221 = arith.truncf %219 : vector<2x32xf32> to vector<2x32xbf16>
    %cst_61 = arith.constant dense<0.000000e+00> : vector<2x128xf32>
    %222 = tpu.matmul %221, %220, %cst_61 {dimension_numbers = #tpu.dot_dimension_numbers<[1], [0], [0], [1], [0, 0, 1, 1], [], []>} : vector<2x32xbf16>, vector<32x128xbf16>, vector<2x128xf32> -> vector<2x128xf32>
    %c10 = arith.constant 10 : index
    %c0_62 = arith.constant 0 : index
    %223 = vector.load %arg3[%c10, %c0_62] : memref<16x128xf32, #tpu.memory_space<vmem>>, vector<1x128xf32>
    %224 = vector.broadcast %223 : vector<1x128xf32> to vector<2x128xf32>
    %225 = arith.addf %222, %224 : vector<2x128xf32>
    %226 = math.tanh %225 : vector<2x128xf32>
    %227 = vector.extract_strided_slice %226 {offsets = [0, 0], sizes = [2, 32], strides = [1, 1]} : vector<2x128xf32> to vector<2x32xf32>
    %c192 = arith.constant 192 : index
    %c0_63 = arith.constant 0 : index
    %228 = vector.load %arg2[%c192, %c0_63] : memref<224x128xbf16, #tpu.memory_space<vmem>>, vector<32x128xbf16>
    %229 = arith.truncf %227 : vector<2x32xf32> to vector<2x32xbf16>
    %cst_64 = arith.constant dense<0.000000e+00> : vector<2x128xf32>
    %230 = tpu.matmul %229, %228, %cst_64 {dimension_numbers = #tpu.dot_dimension_numbers<[1], [0], [0], [1], [0, 0, 1, 1], [], []>} : vector<2x32xbf16>, vector<32x128xbf16>, vector<2x128xf32> -> vector<2x128xf32>
    %c11 = arith.constant 11 : index
    %c0_65 = arith.constant 0 : index
    %231 = vector.load %arg3[%c11, %c0_65] : memref<16x128xf32, #tpu.memory_space<vmem>>, vector<1x128xf32>
    %232 = vector.broadcast %231 : vector<1x128xf32> to vector<2x128xf32>
    %233 = arith.addf %230, %232 : vector<2x128xf32>
    %cst_66 = arith.constant 0.000000e+00 : f32
    %234 = vector.broadcast %cst_66 : f32 to vector<4x128xf32>
    %235 = tpu.concatenate %233, %226, %234 in 0 : vector<2x128xf32>, vector<2x128xf32>, vector<4x128xf32> -> vector<8x128xf32>
    %c0_67 = arith.constant 0 : index
    %c0_68 = arith.constant 0 : index
    %236 = vector.load %arg4[%c0_67, %c0_68] : memref<8x128xf32, #tpu.memory_space<vmem>>, vector<8x128xf32>
    tpu.vector_store %arg4[%c0_67, %c0_68], %235 {strides = array<i32>} : memref<8x128xf32, #tpu.memory_space<vmem>>, vector<8x128xf32>,
    return
  }
}

</mosaic_0001>

<bundles_post_ra>
// kernel: bert_spc_forward.1
= control target key start
LH: loop header
LB: loop body
LE: loop exit
PB: predicated region body
PF: predicated region fallthrough
CT: control target
= control target key end

     0   :  { %9 = vsyncpa [#allocation3], 0  ;;  %s2533_s0 = inlined_call_operand.vmem [shape: s32[16,1], index: 0, kind: input, shape index: {}]   ;;  %s2534_s1 = inlined_call_operand.hbm [shape: f32[80,128], index: 1, kind: input, shape index: {}]   ;;  %s2535_s2 = inlined_call_operand.hbm [shape: bf16[224,128], index: 2, kind: input, shape index: {}]   ;;  %s2536_s3 = inlined_call_operand.vmem [shape: f32[16,128], index: 3, kind: input, shape index: {}]   ;;  %s2537_s4 = inlined_call_operand.vmem [shape: f32[8,128], index: 4, kind: output, shape index: {}]  }
   0x1   :  { %10 = vsyncpa [#allocation5], 0  ;;  %s2176_s15 = smov [#allocation2]   ;;  %s2128_s19 = scalar_lea.hbm %s2534_s1, 1280 }
   0x2   :  { %s18_s16 = sshll.u32 %s2176_s15, 4  ;;  %p2129_p0 = scmp.ne.s32.totalorder %s2534_s1, %s2128_s19  ;;  %s19_s16 = int_to_ptr.vmem [resolvable:$true] %s18_s16 }
   0x3   :  { %p2132_p1 = scmp.lt.u32.totalorder %s2128_s19, %s2534_s1 }
   0x5   :  { %p2134_p2 = pnand %p2132_p1, %p2129_p0 }
   0x7   :  { %2137 = shalt.err (!%p2134_p2)
}
   0x8   :  { %s2138_s24 = scalar_lea.vmem %s19_s16, 1280  ;;  %p2143_p4 = scmp.lt.s32.totalorder %s19_s16, %s19_s16 }
   0x9   :  { %p2139_p3 = scmp.ne.s32.totalorder %s19_s16, %s2138_s24  ;;  %p2144_p5 = scmp.lt.s32.totalorder %s2138_s24, %s2138_s24 }
   0xb   :  { %p2145_p6 = por %p2144_p5, %p2143_p4 }
   0xd   :  { %p2146_p7 = pnand %p2145_p6, %p2139_p3 }
   0xf   :  { %2149 = shalt.err (!%p2146_p7)
}
  0x10   :  { %s2177_s25 = smov 128   ;;  %s2178_s26 = smov 8  }
  0x11   :  { %24 = dma.hbm_to_vmem [thread:$0]  %s2534_s1, 1280, %s19_s16, [#allocation3], %s2177_s25, %s2177_s25, %s2178_s26  }
  0x12   :  { %s2179_s29 = smov [#allocation4]   ;;  %s2150_s7 = scalar_lea.hbm %s2535_s2, 1792 }
  0x13   :  { %s30_s30 = sshll.u32 %s2179_s29, 4  ;;  %p2151_p8 = scmp.ne.s32.totalorder %s2535_s2, %s2150_s7  ;;  %s31_s30 = int_to_ptr.vmem [resolvable:$true] %s30_s30 }
  0x14   :  { %p2154_p9 = scmp.lt.u32.totalorder %s2150_s7, %s2535_s2 }
  0x16   :  { %p2156_p10 = pnand %p2154_p9, %p2151_p8 }
  0x18   :  { %2159 = shalt.err (!%p2156_p10)
}
  0x19   :  { %s2160_s12 = scalar_lea.vmem %s31_s30, 1792  ;;  %p2165_p12 = scmp.lt.s32.totalorder %s31_s30, %s31_s30 }
  0x1a   :  { %p2161_p11 = scmp.ne.s32.totalorder %s31_s30, %s2160_s12  ;;  %p2166_p13 = scmp.lt.s32.totalorder %s2160_s12, %s2160_s12 }
  0x1c   :  { %p2167_p0 = por %p2166_p13, %p2165_p12 }
  0x1e   :  { %p2168_p1 = pnand %p2167_p0, %p2161_p11 }
  0x20   :  { %2171 = shalt.err (!%p2168_p1)
}
  0x21   :  { %s2180_s1 = smov 64   ;;  %s2181_s13 = smov 4  }
  0x22   :  { %36 = dma.hbm_to_vmem [thread:$0]  %s2535_s2, 1792, %s31_s30, [#allocation5], %s2180_s1, %s2180_s1, %s2181_s13  }
  0x23   :  { %2172 = dma.done.wait [#allocation3], 1280  }
  0x24   :  { %2173 = vsyncadd [#allocation3], 4294966016 }
  0x25   :  { %2174 = dma.done.wait [#allocation5], 1792  }
  0x26   :  { %2175 = vsyncadd [#allocation5], 4294965504  ;;  %v2182_v0 = vmov 0   ;;  %v2183_v1 = vmov 0.0   ;;  %v51_v2 = vld [vmem:[%s2533_s0] sm:$0xff]  ;;  %v66_v4 = vld [vmem:[#allocation2 + $0x8] sm:$0xff]  ;;  %v46_v16 = vlaneseq }
  0x27   :  { %2029 = vset.pattern.permute.xlu0 %v2182_v0  ;;  %1850 = vmatprep.subr.bf16.mxu1 %v2183_v1  ;;  %v65_v3 = vld [vmem:[#allocation2] sm:$0xff]  ;;  %v67_v5 = vld [vmem:[#allocation2 + $0x10] sm:$0xff]  ;;  %v68_v6 = vld [vmem:[#allocation2 + $0x18] sm:$0xff]  ;;  %vm74_vm0 = vcmask 523264   ;;  %vm2184_vm4 = vmmov 0   ;;  %vm225_vm5 = vcmask 261120  }
  0x28   :  { %54 = vperm.xlu0 %2029, %v51_v2   ;;  %v52_v7 = vld [vmem:[%s2533_s0 + $0x8] sm:$0xff]  ;;  %v1998_v8 = vpack.c.bf16 %v66_v4, %v65_v3  ;;  %v2002_v9 = vpack.c.bf16 %v68_v6, %v67_v5  ;;  %v69_v10 = vld [vmem:[#allocation2 + $0x20] sm:$0xff]  ;;  %v71_v12 = vld [vmem:[#allocation2 + $0x30] sm:$0xff]  ;;  %v47_v17 = vand.u32 127, %v46_v16  ;;  %1854 = vmatprep.mubr.msk.bf16.mxu1 %vm2184_vm4, %v2183_v1  ;;  %s2185_s24 = smov 120   ;;  %s2186_s25 = smov 96  }
  0x29   :  { %v70_v11 = vld [vmem:[#allocation2 + $0x28] sm:$0xff]  ;;  %v72_v13 = vld [vmem:[#allocation2 + $0x38] sm:$0xff]  ;;  %v73_v22 = vld [vmem:[#allocation2 + $0x40] sm:$0xff]  ;;  %s2187_s27 = smov 112   ;;  %s2188_s28 = smov 104   ;;  %vm301_vm6 = vcmask 64512  }
  0x2a   :  { %1999 = vmatprep.subr.bf16.mxu0 %v1998_v8  ;;  %v2006_v14 = vpack.c.bf16 %v70_v11, %v69_v10  ;;  %v2010_v15 = vpack.c.bf16 %v72_v13, %v71_v12  ;;  %vm48_vm3 = vcmp.lt.s32.totalorder %v47_v17, 32  ;;  %v1720_v24 = vld [vmem:[#allocation2 + $0x48] ss:$0 sm:$0xff]  ;;  %v2060_v43 = vld [vmem:[#allocation4] sm:$0xff]   ;;  %v2061_v44 = vld [vmem:[#allocation4 + $0x8] sm:$0xff]   ;;  %vm800_vm7 = vcmask 1043456  }
  0x2b   :  { %2001 = vmatpush3.bf16.msra.mxu0 %v1998_v8  ;;  %v2256_v28 = vsel %vm48_vm3, 1.0, %v2183_v1  ;;  %1851 = vmatpush3.bf16.msra.mxu1 %v2060_v43  ;;  %v1721_v53 = vld [vmem:[%s2536_s3] ss:$0 sm:$0xff]  ;;  %v1722_v57 = vld [vmem:[%s2536_s3 + $0x1] ss:$0 sm:$0xff]  ;;  %s2190_s29 = smov 24  }
  0x2c   :  { %57 = vperm.xlu0 %2029, %v52_v7   ;;  %2003 = vmatprep.subr.bf16.mxu0 %v2002_v9  ;;  %v1723_v62 = vld [vmem:[%s2536_s3 + $0x2] ss:$0 sm:$0xff]  ;;  %vm1206_vm8 = vcmask 130048   ;;  %vm1209_vm9 = vcmask 195584   ;;  %vm1578_vm12 = vcmask 1041409   ;;  %vm1705_vm13 = vcmask 1041408  }
  0x2d   :  { %1852 = vmatprep.subr.bf16.mxu1 %v2183_v1 }
  0x2f   :  { %2005 = vmatpush3.bf16.msra.mxu0 %v2002_v9  ;;  %1853 = vmatpush3.bf16.msra.mxu1 %v2061_v44 }
  0x30   :  { %2007 = vmatprep.subr.bf16.mxu0 %v2006_v14  ;;  %1858 = vmatprep.subr.bf16.mxu1 %v2183_v1 }
  0x33   :  { %2009 = vmatpush3.bf16.msra.mxu0 %v2006_v14 }
  0x34   :  { %2011 = vmatprep.subr.bf16.mxu0 %v2010_v15 }
  0x37   :  { %2013 = vmatpush3.bf16.msra.mxu0 %v2010_v15 }
  0x38   :  { %1864 = vmatprep.subr.bf16.mxu0 %v2183_v1 }
  0xa7   :  { %v55_v18 = vpop.permute.xlu0 %54 }
  0xa8   :  { %vm59_vm1 = vcmp.eq.s32.totalorder %v55_v18, %v47_v17 }
  0xa9   :  { %v1716_v19 = vsel %vm59_vm1, 1.0, %v2183_v1 }
  0xaa   :  { %1847 = vmatprep.mubr.msk.f32.mxu0 %vm74_vm0, %v1716_v19 }
  0xab   :  { %v58_v20 = vpop.permute.xlu0 %57 }
  0xac   :  { %vm60_vm2 = vcmp.eq.s32.totalorder %v58_v20, %v47_v17 }
  0xad   :  { %v1717_v21 = vsel %vm60_vm2, 1.0, %v2183_v1 }
  0xae   :  { %1848 = vmatmul.mubr.msk.f32.vlgmr.msra.gmra.mrb[0].mxu0 %vm74_vm0, %v1717_v21 }
  0xaf   :  { %1866 = vmatprep.mubr.msk.bf16.mxu0 %vm2184_vm4, %v2183_v1 }
 0x181   :  { %v1849_v23 = vpop.f32.mrb[0].mxu0 }
 0x182   :  { %v147_v25 = vpop.f32.mrb[1].mxu0  ;;  %v153_v26 = vadd.f32 %v1849_v23, %v73_v22 }
 0x183   :  { %v148_v27 = vadd.f32 %v147_v25, %v73_v22 }
 0x184   :  { %v162_v30 = vadd.f32 %v1720_v24, %v153_v26 }
 0x185   :  { %v161_v29 = vadd.f32 %v1720_v24, %v148_v27 }
 0x186   :  { %v166_v32 = vmul.f32 %v2256_v28, %v162_v30 }
 0x187   :  { %v165_v31 = vmul.f32 %v2256_v28, %v161_v29 }
 0x189   :  { %167 = vadd.xlane.f32.xlu1 %v165_v31 }
 0x18d   :  { %169 = vadd.xlane.f32.xlu1 %v166_v32 }
 0x216   :  { %v168_v33 = vpop.xlane.xlu1 %167 }
 0x217   :  { %v171_v34 = vmul.f32 0.03125, %v168_v33 }
 0x219   :  { %v173_v35 = vsub.f32 %v165_v31, %v171_v34 }
 0x21a   :  { %v170_v36 = vpop.xlane.xlu1 %169 }
 0x21b   :  { %v172_v37 = vmul.f32 0.03125, %v170_v36  ;;  %v175_v38 = vmul.f32 %v2256_v28, %v173_v35 }
 0x21d   :  { %v174_v39 = vsub.f32 %v166_v32, %v172_v37  ;;  %v177_v40 = vmul.f32 %v175_v38, %v175_v38 }
 0x21f   :  { %179 = vadd.xlane.f32.xlu0 %v177_v40  ;;  %v176_v41 = vmul.f32 %v2256_v28, %v174_v39 }
 0x221   :  { %v178_v42 = vmul.f32 %v176_v41, %v176_v41 }
 0x223   :  { %181 = vadd.xlane.f32.xlu1 %v178_v42 }
 0x2ac   :  { %v180_v45 = vpop.xlane.xlu0 %179 }
 0x2ad   :  { %v183_v46 = vmul.f32 0.03125, %v180_v45 }
 0x2af   :  { %v185_v47 = vadd.f32 1e-12, %v183_v46 }
 0x2b0   :  { %v182_v48 = vpop.xlane.xlu1 %181 }
 0x2b1   :  { %2074 = vrsqrt.f32 %v185_v47  ;;  %v184_v49 = vmul.f32 0.03125, %v182_v48 }
 0x2b3   :  { %v186_v50 = vadd.f32 1e-12, %v184_v49 }
 0x2b5   :  { %2076 = vrsqrt.f32 %v186_v50 }
 0x2bb   :  { %v2075_v51 = vpop.eup %2074 }
 0x2bc   :  { %v189_v52 = vmul.f32 %v2075_v51, %v175_v38 }
 0x2be   :  { %v195_v56 = vmul.f32 %v1721_v53, %v189_v52 }
 0x2bf   :  { %v2077_v54 = vpop.eup %2076 }
 0x2c0   :  { %v190_v55 = vmul.f32 %v2077_v54, %v176_v41  ;;  %v2274_v59 = vadd.f32 %v1722_v57, %v195_v56 }
 0x2c2   :  { %v196_v58 = vmul.f32 %v1721_v53, %v190_v55 }
 0x2c4   :  { %v2276_v60 = vadd.f32 %v1722_v57, %v196_v58 }
 0x2c6   :  { %v207_v61 = vpack.c.bf16 %v2276_v60, %v2274_v59 }
 0x2c8   :  { %1855 = vmatmul.mubr.msk.bf16.vlgmr.msra.gmra.mrb[0].mxu1 %vm225_vm5, %v207_v61 }
 0x2c9   :  { %1860 = vmatprep.mubr.msk.bf16.mxu1 %vm2184_vm4, %v2183_v1 }
 0x39b   :  { %v263_v63 = vpop.f32.mrb[0].mxu1 }
 0x39c   :  { %v1856_v0 = vpop.f32.mrb[1].mxu1  ;;  %v264_v3 = vadd.f32 %v1723_v62, %v263_v63 }
 0x39d   :  { %v266_v2 = vpop.f32.mrb[2].mxu1 }
 0x39e   :  { %v267_v4 = vadd.f32 %v1723_v62, %v266_v2  ;;  %v1857_v5 = vpop.f32.mrb[3].mxu1  ;;  %v290_v8 = vpack.c.bf16 %v264_v3, %v264_v3 }
 0x3a0   :  { %v2030_v6 = vpack.i.bf16 %v267_v4, %v264_v3  ;;  %v291_v7 = vpack.c.bf16 %v267_v4, %v267_v4 }
 0x3a2   :  { %2031 = vrot.lane.b32.xlu1 %v2030_v6, %s2185_s24  ;;  %349 = vrot.lane.b32.xlu0 %v291_v7, %s2186_s25 }
 0x3a6   :  { %2036 = vrot.lane.b32.xlu1 %v2030_v6, %s2187_s27 }
 0x3aa   :  { %2041 = vrot.lane.b32.xlu1 %v2030_v6, %s2188_s28 }
 0x3ae   :  { %299 = vrot.lane.b32.xlu1 %v290_v8, %s2186_s25 }
 0x414   :  { %v2032_v9 = vpop.permute.xlu1 %2031  ;;  %v350_v10 = vpop.permute.xlu0 %349 }
 0x415   :  { %v2033_v11 = vunpack.i.l.bf16 %v2032_v9  ;;  %v355_v12 = vsel %vm301_vm6, %v350_v10, 0  ;;  %v2034_v13 = vunpack.i.h.bf16 %v2032_v9 }
 0x416   :  { %1865 = vmatpush3.bf16.xpose.msra.mxu0 %v355_v12 }
 0x417   :  { %v2289_v14 = vpack.c.bf16 %v2033_v11, %v2033_v11  ;;  %1876 = vmatprep.subr.bf16.mxu0 %v2183_v1  ;;  %v2294_v16 = vpack.c.bf16 %v2034_v13, %v2034_v13 }
 0x418   :  { %v2037_v15 = vpop.permute.xlu1 %2036 }
 0x419   :  { %398 = vrot.lane.b32.xlu1 %v2289_v14, %s2186_s25  ;;  %v2038_v17 = vunpack.i.l.bf16 %v2037_v15  ;;  %v2039_v20 = vunpack.i.h.bf16 %v2037_v15 }
 0x41b   :  { %v2301_v21 = vpack.c.bf16 %v2038_v17, %v2038_v17  ;;  %v2310_v25 = vpack.c.bf16 %v2039_v20, %v2039_v20 }
 0x41c   :  { %v2042_v18 = vpop.permute.xlu1 %2041 }
 0x41d   :  { %v2044_v19 = vunpack.i.h.bf16 %v2042_v18  ;;  %447 = vrot.lane.b32.xlu1 %v2294_v16, %s2186_s25  ;;  %1867 = vmatmul.mubr.msk.bf16.vlgmr.msra.gmra.mrb[4].mxu0 %vm301_vm6, %v291_v7  ;;  %v2043_v26 = vunpack.i.l.bf16 %v2042_v18 }
 0x41e   :  { %1878 = vmatprep.mubr.msk.bf16.mxu0 %vm2184_vm4, %v2183_v1 }
 0x41f   :  { %v2303_v22 = vpack.c.bf16 %v2044_v19, %v2044_v19  ;;  %v2316_v27 = vpack.c.bf16 %v2043_v26, %v2043_v26 }
 0x420   :  { %v300_v23 = vpop.permute.xlu1 %299 }
 0x421   :  { %v306_v24 = vsel %vm301_vm6, %v300_v23, 0  ;;  %496 = vrot.lane.b32.xlu1 %v2301_v21, %s2186_s25  ;;  %643 = vrot.lane.b32.xlu0 %v2303_v22, %s2186_s25 }
 0x422   :  { %1859 = vmatpush3.bf16.xpose.msra.mxu1 %v306_v24 }
 0x423   :  { %1870 = vmatprep.subr.bf16.mxu1 %v2183_v1 }
 0x425   :  { %545 = vrot.lane.b32.xlu1 %v2310_v25, %s2186_s25  ;;  %795 = vrot.lane.b32.xlu0 %v290_v8, %s2180_s1 }
 0x429   :  { %1861 = vmatmul.mubr.msk.bf16.vlgmr.msra.gmra.mrb[4].mxu1 %vm301_vm6, %v290_v8  ;;  %594 = vrot.lane.b32.xlu1 %v2316_v27, %s2186_s25 }
 0x42a   :  { %1872 = vmatprep.mubr.msk.bf16.mxu1 %vm2184_vm4, %v2183_v1 }
 0x42d   :  { %844 = vrot.lane.b32.xlu1 %v291_v7, %s2180_s1 }
 0x48b   :  { %v399_v29 = vpop.permute.xlu1 %398 }
 0x48c   :  { %v404_v30 = vsel %vm301_vm6, %v399_v29, 0 }
 0x48d   :  { %1871 = vmatpush3.bf16.xpose.msra.mxu1 %v404_v30 }
 0x48e   :  { %1882 = vmatprep.subr.bf16.mxu1 %v2183_v1 }
 0x48f   :  { %v448_v31 = vpop.permute.xlu1 %447 }
 0x490   :  { %v453_v32 = vsel %vm301_vm6, %v448_v31, 0 }
 0x491   :  { %1877 = vmatpush3.bf16.xpose.msra.mxu0 %v453_v32 }
 0x492   :  { %1888 = vmatprep.subr.bf16.mxu0 %v2183_v1 }
 0x493   :  { %v497_v33 = vpop.permute.xlu1 %496  ;;  %v644_v37 = vpop.permute.xlu0 %643 }
 0x494   :  { %v502_v34 = vsel %vm301_vm6, %v497_v33, 0  ;;  %1873 = vmatmul.mubr.msk.bf16.vlgmr.msra.gmra.mrb[8].mxu1 %vm301_vm6, %v2289_v14  ;;  %v649_v40 = vsel %vm301_vm6, %v644_v37, 0 }
 0x495   :  { %1883 = vmatpush3.bf16.xpose.msra.mxu1 %v502_v34  ;;  %1884 = vmatprep.mubr.msk.bf16.mxu1 %vm2184_vm4, %v2183_v1 }
 0x496   :  { %1894 = vmatprep.subr.bf16.mxu1 %v2183_v1 }
 0x497   :  { %v546_v35 = vpop.permute.xlu1 %545  ;;  %v796_v41 = vpop.permute.xlu0 %795 }
 0x498   :  { %v551_v36 = vsel %vm301_vm6, %v546_v35, 0  ;;  %1879 = vmatmul.mubr.msk.bf16.vlgmr.msra.gmra.mrb[8].mxu0 %vm301_vm6, %v2294_v16  ;;  %v802_v42 = vsel %vm800_vm7, %v796_v41, 0 }
 0x499   :  { %1889 = vmatpush3.bf16.xpose.msra.mxu0 %v551_v36  ;;  %1890 = vmatprep.mubr.msk.bf16.mxu0 %vm2184_vm4, %v2183_v1 }
 0x49a   :  { %1900 = vmatprep.subr.bf16.mxu0 %v2183_v1 }
 0x49b   :  { %v595_v38 = vpop.permute.xlu1 %594 }
 0x49c   :  { %v600_v39 = vsel %vm301_vm6, %v595_v38, 0  ;;  %1885 = vmatmul.mubr.msk.bf16.vlgmr.msra.gmra.mrb[12].mxu1 %vm301_vm6, %v2301_v21 }
 0x49d   :  { %1895 = vmatpush3.bf16.xpose.msra.mxu1 %v600_v39  ;;  %1896 = vmatprep.mubr.msk.bf16.mxu1 %vm2184_vm4, %v2183_v1 }
 0x49e   :  { %1906 = vmatprep.subr.bf16.mxu1 %v2183_v1 }
 0x49f   :  { %v845_v43 = vpop.permute.xlu1 %844 }
 0x4a0   :  { %1891 = vmatmul.mubr.msk.bf16.vlgmr.msra.gmra.mrb[12].mxu0 %vm301_vm6, %v2310_v25  ;;  %v850_v44 = vsel %vm800_vm7, %v845_v43, 0 }
 0x4a1   :  { %1901 = vmatpush3.bf16.xpose.msra.mxu0 %v649_v40  ;;  %1902 = vmatprep.mubr.msk.bf16.mxu0 %vm2184_vm4, %v2183_v1 }
 0x4a2   :  { %1912 = vmatprep.subr.bf16.mxu0 %v2183_v1 }
 0x4a4   :  { %1897 = vmatmul.mubr.msk.bf16.vlgmr.msra.gmra.mrb[16].mxu1 %vm301_vm6, %v2316_v27 }
 0x4a5   :  { %1907 = vmatpush3.bf16.msra.mxu1 %v802_v42  ;;  %1908 = vmatprep.mubr.msk.bf16.mxu1 %vm2184_vm4, %v2183_v1 }
 0x4a6   :  { %1918 = vmatprep.subr.bf16.mxu1 %v2183_v1 }
 0x4a8   :  { %1903 = vmatmul.mubr.msk.bf16.vlgmr.msra.gmra.mrb[16].mxu0 %vm301_vm6, %v2303_v22 }
 0x4a9   :  { %1913 = vmatpush3.bf16.msra.mxu0 %v850_v44  ;;  %1914 = vmatprep.mubr.msk.bf16.mxu0 %vm2184_vm4, %v2183_v1 }
 0x4aa   :  { %1924 = vmatprep.subr.bf16.mxu0 %v2183_v1 }
 0x4f0   :  { %v391_v45 = vpop.f32.mrb[4].mxu0 }
 0x4f1   :  { %v692_v46 = vmul.f32 0.35355338, %v391_v45  ;;  %v1868_v47 = vpop.f32.mrb[5].mxu0 }
 0x4f2   :  { %v394_v48 = vpop.f32.mrb[6].mxu0 }
 0x4f3   :  { %v1869_v49 = vpop.f32.mrb[7].mxu0  ;;  %v702_v50 = vsel %vm301_vm6, %v692_v46, -inf }
 0x4f4   :  { %703 = vmax.xlane.f32.xlu0 %v702_v50 }
 0x4fc   :  { %v342_v51 = vpop.f32.mrb[4].mxu1 }
 0x4fd   :  { %v691_v52 = vmul.f32 0.35355338, %v342_v51  ;;  %v1862_v53 = vpop.f32.mrb[5].mxu1 }
 0x4fe   :  { %v345_v54 = vpop.f32.mrb[6].mxu1 }
 0x4ff   :  { %v1863_v55 = vpop.f32.mrb[7].mxu1  ;;  %v699_v56 = vsel %vm301_vm6, %v691_v52, -inf }
 0x500   :  { %700 = vmax.xlane.f32.xlu1 %v699_v56 }
 0x567   :  { %v440_v57 = vpop.f32.mrb[8].mxu1 }
 0x568   :  { %v693_v58 = vmul.f32 0.35355338, %v440_v57  ;;  %v1874_v61 = vpop.f32.mrb[9].mxu1 }
 0x569   :  { %v443_v62 = vpop.f32.mrb[10].mxu1 }
 0x56a   :  { %v1875_v63 = vpop.f32.mrb[11].mxu1  ;;  %v705_v0 = vsel %vm301_vm6, %v693_v58, -inf }
 0x56b   :  { %v489_v2 = vpop.f32.mrb[8].mxu0  ;;  %706 = vmax.xlane.f32.xlu0 %v705_v0 }
 0x56c   :  { %v694_v3 = vmul.f32 0.35355338, %v489_v2  ;;  %v1880_v4 = vpop.f32.mrb[9].mxu0 }
 0x56d   :  { %v492_v5 = vpop.f32.mrb[10].mxu0 }
 0x56e   :  { %v1881_v6 = vpop.f32.mrb[11].mxu0  ;;  %v708_v7 = vsel %vm301_vm6, %v694_v3, -inf }
 0x56f   :  { %709 = vmax.xlane.f32.xlu1 %v708_v7  ;;  %v538_v8 = vpop.f32.mrb[12].mxu1 }
 0x570   :  { %v2368_v9 = vmul.f32 0.35355338, %v538_v8  ;;  %v1886_v10 = vpop.f32.mrb[13].mxu1 }
 0x571   :  { %v541_v11 = vpop.f32.mrb[14].mxu1 }
 0x572   :  { %v1887_v12 = vpop.f32.mrb[15].mxu1  ;;  %v711_v13 = vsel %vm301_vm6, %v2368_v9, -inf }
 0x573   :  { %v587_v15 = vpop.f32.mrb[12].mxu0  ;;  %712 = vmax.xlane.f32.xlu0 %v711_v13 }
 0x574   :  { %v696_v17 = vmul.f32 0.35355338, %v587_v15  ;;  %v1892_v18 = vpop.f32.mrb[13].mxu0 }
 0x575   :  { %v590_v19 = vpop.f32.mrb[14].mxu0 }
 0x576   :  { %v1893_v20 = vpop.f32.mrb[15].mxu0  ;;  %v714_v23 = vsel %vm301_vm6, %v696_v17, -inf }
 0x577   :  { %715 = vmax.xlane.f32.xlu1 %v714_v23  ;;  %v636_v24 = vpop.f32.mrb[16].mxu1 }
 0x578   :  { %v2373_v26 = vmul.f32 0.35355338, %v636_v24  ;;  %v1898_v29 = vpop.f32.mrb[17].mxu1 }
 0x579   :  { %v639_v30 = vpop.f32.mrb[18].mxu1 }
 0x57a   :  { %v1899_v31 = vpop.f32.mrb[19].mxu1  ;;  %v717_v32 = vsel %vm301_vm6, %v2373_v26, -inf }
 0x57b   :  { %v685_v33 = vpop.f32.mrb[16].mxu0  ;;  %718 = vmax.xlane.f32.xlu0 %v717_v32 }
 0x57c   :  { %v698_v34 = vmul.f32 0.35355338, %v685_v33  ;;  %v1904_v35 = vpop.f32.mrb[17].mxu0 }
 0x57d   :  { %v688_v36 = vpop.f32.mrb[18].mxu0 }
 0x57e   :  { %v1905_v37 = vpop.f32.mrb[19].mxu0  ;;  %v720_v38 = vsel %vm301_vm6, %v698_v34, -inf }
 0x57f   :  { %721 = vmax.xlane.f32.xlu1 %v720_v38 }
 0x581   :  { %v704_v41 = vpop.xlane.xlu0 %703 }
 0x582   :  { %v724_v42 = vsub.f32 %v692_v46, %v704_v41 }
 0x584   :  { %v733_v44 = vmul.f32 1.442695, %v724_v42 }
 0x58d   :  { %v701_v39 = vpop.xlane.xlu1 %700 }
 0x58e   :  { %v723_v40 = vsub.f32 %v691_v52, %v701_v39 }
 0x590   :  { %892 = vrot.lane.b32.xlu1 %v2289_v14, %s2180_s1  ;;  %v731_v43 = vmul.f32 1.442695, %v723_v40 }
 0x591   :  { %940 = vrot.lane.b32.xlu0 %v2294_v16, %s2180_s1 }
 0x592   :  { %2078 = vpow2.f32 %v731_v43 }
 0x593   :  { %2080 = vpow2.f32 %v733_v44 }
 0x59c   :  { %v2079_v45 = vpop.eup %2078 }
 0x59d   :  { %v747_v47 = vsel %vm301_vm6, %v2079_v45, 0.0  ;;  %v2081_v48 = vpop.eup %2080 }
 0x59e   :  { %v750_v49 = vsel %vm301_vm6, %v2081_v48, 0.0 }
 0x5b0   :  { %748 = vadd.xlane.f32.xlu0 %v747_v47 }
 0x5b4   :  { %751 = vadd.xlane.f32.xlu1 %v750_v49 }
 0x5c5   :  { %988 = vrot.lane.b32.xlu1 %v2301_v21, %s2180_s1 }
 0x5f8   :  { %v707_v14 = vpop.xlane.xlu0 %706 }
 0x5f9   :  { %v725_v16 = vsub.f32 %v693_v58, %v707_v14 }
 0x5fb   :  { %v735_v50 = vmul.f32 1.442695, %v725_v16 }
 0x5fc   :  { %v710_v51 = vpop.xlane.xlu1 %709 }
 0x5fd   :  { %2082 = vpow2.f32 %v735_v50  ;;  %v726_v46 = vsub.f32 %v694_v3, %v710_v51 }
 0x5ff   :  { %v737_v52 = vmul.f32 1.442695, %v726_v46 }
 0x600   :  { %v713_v5 = vpop.xlane.xlu0 %712 }
 0x601   :  { %2084 = vpow2.f32 %v737_v52  ;;  %v727_v6 = vsub.f32 %v2368_v9, %v713_v5 }
 0x603   :  { %v739_v8 = vmul.f32 1.442695, %v727_v6 }
 0x604   :  { %v716_v53 = vpop.xlane.xlu1 %715 }
 0x605   :  { %v728_v54 = vsub.f32 %v696_v17, %v716_v53 }
 0x607   :  { %v2386_v55 = vpop.eup %2082  ;;  %v741_v56 = vmul.f32 1.442695, %v728_v54 }
 0x608   :  { %v753_v57 = vsel %vm301_vm6, %v2386_v55, 0.0  ;;  %v719_v7 = vpop.xlane.xlu0 %718 }
 0x609   :  { %2086 = vpow2.f32 %v741_v56  ;;  %754 = vadd.xlane.f32.xlu0 %v753_v57  ;;  %v729_v10 = vsub.f32 %v2373_v26, %v719_v7 }
 0x60b   :  { %v2390_v61 = vpop.eup %2084  ;;  %v743_v11 = vmul.f32 1.442695, %v729_v10 }
 0x60c   :  { %v722_v21 = vpop.xlane.xlu1 %721  ;;  %v756_v58 = vsel %vm301_vm6, %v2390_v61, 0.0  ;;  %v941_v12 = vpop.permute.xlu0 %940 }
 0x60d   :  { %v730_v62 = vsub.f32 %v698_v34, %v722_v21  ;;  %757 = vadd.xlane.f32.xlu1 %v756_v58  ;;  %v946_v31 = vsel %vm800_vm7, %v941_v12, 0 }
 0x60f   :  { %v745_v63 = vmul.f32 1.442695, %v730_v62 }
 0x610   :  { %v893_v15 = vpop.permute.xlu1 %892 }
 0x611   :  { %2088 = vpow2.f32 %v745_v63  ;;  %v898_v26 = vsel %vm800_vm7, %v893_v15, 0 }
 0x612   :  { %2090 = vpow2.f32 %v739_v8 }
 0x613   :  { %v2394_v0 = vpop.eup %2086  ;;  %2092 = vpow2.f32 %v743_v11 }
 0x614   :  { %v762_v2 = vsel %vm301_vm6, %v2394_v0, 0.0 }
 0x615   :  { %763 = vadd.xlane.f32.xlu1 %v762_v2 }
 0x61b   :  { %v2398_v3 = vpop.eup %2088 }
 0x61c   :  { %v768_v4 = vsel %vm301_vm6, %v2398_v3, 0.0  ;;  %v2408_v13 = vpop.eup %2090 }
 0x61d   :  { %769 = vadd.xlane.f32.xlu1 %v768_v4  ;;  %v2412_v18 = vpop.eup %2092 }
 0x61e   :  { %v765_v19 = vsel %vm301_vm6, %v2412_v18, 0.0 }
 0x61f   :  { %1036 = vrot.lane.b32.xlu0 %v2310_v25, %s2180_s1  ;;  %v759_v25 = vsel %vm301_vm6, %v2408_v13, 0.0 }
 0x62e   :  { %1084 = vrot.lane.b32.xlu1 %v2316_v27, %s2180_s1 }
 0x63d   :  { %v749_v17 = vpop.xlane.xlu0 %748 }
 0x63e   :  { %2094 = vrcp.f32 %v749_v17  ;;  %760 = vadd.xlane.f32.xlu0 %v759_v25 }
 0x641   :  { %v752_v9 = vpop.xlane.xlu1 %751 }
 0x642   :  { %2096 = vrcp.f32 %v752_v9  ;;  %766 = vadd.xlane.f32.xlu0 %v765_v19 }
 0x645   :  { %v989_v32 = vpop.permute.xlu1 %988 }
 0x646   :  { %v994_v40 = vsel %vm800_vm7, %v989_v32, 0 }
 0x648   :  { %v2095_v27 = vpop.eup %2094 }
 0x649   :  { %v779_v20 = vmul.f32 %v2095_v27, %v2079_v45 }
 0x64b   :  { %v787_v23 = vpack.c.bf16 %v779_v20, %v779_v20  ;;  %v2062_v20 = vld [vmem:[#allocation4 + $0x10] sm:$0xff]  }
 0x64c   :  { %v2097_v24 = vpop.eup %2096 }
 0x64d   :  { %v780_v29 = vmul.f32 %v2097_v24, %v2081_v48  ;;  %1909 = vmatmul.mubr.msk.bf16.vlgmr.msra.gmra.mrb[20].mxu1 %vm301_vm6, %v787_v23 }
 0x64e   :  { %1919 = vmatpush3.bf16.msra.mxu1 %v898_v26  ;;  %1920 = vmatprep.mubr.msk.bf16.mxu1 %vm2184_vm4, %v2183_v1 }
 0x64f   :  { %v788_v30 = vpack.c.bf16 %v780_v29, %v780_v29  ;;  %1930 = vmatprep.subr.bf16.mxu1 %v2183_v1  ;;  %v2063_v29 = vld [vmem:[#allocation4 + $0x18] sm:$0xff]  }
 0x651   :  { %1915 = vmatmul.mubr.msk.bf16.vlgmr.msra.gmra.mrb[20].mxu0 %vm301_vm6, %v788_v30 }
 0x652   :  { %1925 = vmatpush3.bf16.msra.mxu0 %v946_v31  ;;  %1926 = vmatprep.mubr.msk.bf16.mxu0 %vm2184_vm4, %v2183_v1 }
 0x653   :  { %1936 = vmatprep.subr.bf16.mxu0 %v2183_v1 }
 0x658   :  { %1132 = vrot.lane.b32.xlu0 %v2303_v22, %s2180_s1 }
 0x696   :  { %v755_v33 = vpop.xlane.xlu0 %754 }
 0x697   :  { %2098 = vrcp.f32 %v755_v33 }
 0x69a   :  { %v758_v34 = vpop.xlane.xlu1 %757  ;;  %v1037_v42 = vpop.permute.xlu0 %1036 }
 0x69b   :  { %2100 = vrcp.f32 %v758_v34  ;;  %v1042_v43 = vsel %vm800_vm7, %v1037_v42, 0 }
 0x6a1   :  { %v2099_v35 = vpop.eup %2098 }
 0x6a2   :  { %v781_v36 = vmul.f32 %v2099_v35, %v2386_v55  ;;  %v764_v37 = vpop.xlane.xlu1 %763 }
 0x6a3   :  { %2102 = vrcp.f32 %v764_v37 }
 0x6a4   :  { %v789_v38 = vpack.c.bf16 %v781_v36, %v781_v36 }
 0x6a5   :  { %v2101_v39 = vpop.eup %2100 }
 0x6a6   :  { %v782_v41 = vmul.f32 %v2101_v39, %v2390_v61  ;;  %1921 = vmatmul.mubr.msk.bf16.vlgmr.msra.gmra.mrb[24].mxu1 %vm301_vm6, %v789_v38 }
 0x6a7   :  { %1931 = vmatpush3.bf16.msra.mxu1 %v994_v40  ;;  %1932 = vmatprep.mubr.msk.bf16.mxu1 %vm2184_vm4, %v2183_v1 }
 0x6a8   :  { %v790_v22 = vpack.c.bf16 %v782_v41, %v782_v41  ;;  %1942 = vmatprep.subr.bf16.mxu1 %v2183_v1 }
 0x6aa   :  { %1927 = vmatmul.mubr.msk.bf16.vlgmr.msra.gmra.mrb[24].mxu0 %vm301_vm6, %v790_v22  ;;  %v770_v48 = vpop.xlane.xlu1 %769 }
 0x6ab   :  { %1937 = vmatpush3.bf16.msra.mxu0 %v1042_v43  ;;  %1938 = vmatprep.mubr.msk.bf16.mxu0 %vm2184_vm4, %v2183_v1  ;;  %2104 = vrcp.f32 %v770_v48 }
 0x6ac   :  { %1948 = vmatprep.subr.bf16.mxu0 %v2183_v1 }
 0x6ad   :  { %v2103_v44 = vpop.eup %2102 }
 0x6ae   :  { %v784_v45 = vmul.f32 %v2103_v44, %v2394_v0  ;;  %v1085_v55 = vpop.permute.xlu1 %1084 }
 0x6af   :  { %v1090_v61 = vsel %vm800_vm7, %v1085_v55, 0 }
 0x6b0   :  { %v792_v47 = vpack.c.bf16 %v784_v45, %v784_v45 }
 0x6b2   :  { %1939 = vmatmul.mubr.msk.bf16.vlgmr.msra.gmra.mrb[28].mxu0 %vm301_vm6, %v792_v47 }
 0x6b3   :  { %1950 = vmatprep.mubr.msk.bf16.mxu0 %vm2184_vm4, %v2183_v1 }
 0x6b5   :  { %v2105_v14 = vpop.eup %2104 }
 0x6b6   :  { %v786_v50 = vmul.f32 %v2105_v14, %v2398_v3 }
 0x6b8   :  { %v794_v53 = vpack.c.bf16 %v786_v50, %v786_v50 }
 0x6cb   :  { %v761_v49 = vpop.xlane.xlu0 %760 }
 0x6cc   :  { %2106 = vrcp.f32 %v761_v49 }
 0x6cf   :  { %v767_v16 = vpop.xlane.xlu0 %766 }
 0x6d0   :  { %2108 = vrcp.f32 %v767_v16 }
 0x6d3   :  { %v1133_v51 = vpop.permute.xlu0 %1132 }
 0x6d4   :  { %v1138_v46 = vsel %vm800_vm7, %v1133_v51, 0 }
 0x6d5   :  { %1949 = vmatpush3.bf16.msra.mxu0 %v1138_v46 }
 0x6d6   :  { %v2107_v52 = vpop.eup %2106  ;;  %1962 = vmatprep.subr.bf16.mxu0 %v2183_v1 }
 0x6d7   :  { %v783_v54 = vmul.f32 %v2107_v52, %v2408_v13 }
 0x6d8   :  { %1951 = vmatmul.mubr.msk.bf16.vlgmr.msra.gmra.mrb[32].mxu0 %vm301_vm6, %v794_v53 }
 0x6d9   :  { %v791_v56 = vpack.c.bf16 %v783_v54, %v783_v54  ;;  %1966 = vmatprep.mubr.msk.bf16.mxu0 %vm2184_vm4, %v2183_v1  ;;  %v1743_v54 = vld [vmem:[%s2536_s3 + $0x3] ss:$0 sm:$0xff] }
 0x6da   :  { %v2109_v57 = vpop.eup %2108 }
 0x6db   :  { %1933 = vmatmul.mubr.msk.bf16.vlgmr.msra.gmra.mrb[28].mxu1 %vm301_vm6, %v791_v56  ;;  %v785_v21 = vmul.f32 %v2109_v57, %v2412_v18 }
 0x6dc   :  { %1943 = vmatpush3.bf16.msra.mxu1 %v1090_v61  ;;  %1944 = vmatprep.mubr.msk.bf16.mxu1 %vm2184_vm4, %v2183_v1 }
 0x6dd   :  { %1954 = vmatprep.subr.bf16.mxu1 %v2183_v1  ;;  %v793_v58 = vpack.c.bf16 %v785_v21, %v785_v21 }
 0x6e3   :  { %1945 = vmatmul.mubr.msk.bf16.vlgmr.msra.gmra.mrb[32].mxu1 %vm301_vm6, %v793_v58 }
 0x6e4   :  { %1958 = vmatprep.mubr.msk.bf16.mxu1 %vm2184_vm4, %v2183_v1  ;;  %1955 = vmatpush3.bf16.msra.mxu1 %v2062_v20 }
 0x6e5   :  { %1956 = vmatprep.subr.bf16.mxu1 %v2183_v1 }
 0x6e8   :  { %1957 = vmatpush3.bf16.msra.mxu1 %v2063_v29 }
 0x6e9   :  { %1970 = vmatprep.subr.bf16.mxu1 %v2183_v1 }
 0x720   :  { %v838_v62 = vpop.f32.mrb[20].mxu1 }
 0x721   :  { %v1910_v63 = vpop.f32.mrb[21].mxu1 }
 0x722   :  { %v841_v0 = vpop.f32.mrb[22].mxu1 }
 0x723   :  { %v1911_v2 = vpop.f32.mrb[23].mxu1 }
 0x724   :  { %v886_v3 = vpop.f32.mrb[20].mxu0 }
 0x725   :  { %v1916_v4 = vpop.f32.mrb[21].mxu0 }
 0x726   :  { %v889_v5 = vpop.f32.mrb[22].mxu0 }
 0x727   :  { %v1917_v6 = vpop.f32.mrb[23].mxu0 }
 0x779   :  { %v934_v7 = vpop.f32.mrb[24].mxu1 }
 0x77a   :  { %v1922_v8 = vpop.f32.mrb[25].mxu1 }
 0x77b   :  { %v937_v10 = vpop.f32.mrb[26].mxu1 }
 0x77c   :  { %v1923_v11 = vpop.f32.mrb[27].mxu1 }
 0x77d   :  { %v982_v12 = vpop.f32.mrb[24].mxu0 }
 0x77e   :  { %v2045_v13 = vpack.i.bf16 %v982_v12, %v934_v7  ;;  %v1928_v15 = vpop.f32.mrb[25].mxu0 }
 0x77f   :  { %v985_v17 = vpop.f32.mrb[26].mxu0 }
 0x780   :  { %v1929_v25 = vpop.f32.mrb[27].mxu0  ;;  %2046 = vrot.lane.b32.xlu1 %v2045_v13, %s2178_s26  ;;  %s2189_s26 = smov 16   ;;  %v2065_v13 = vld [vmem:[#allocation4 + $0x28] sm:$0xff]  }
 0x785   :  { %v1078_v18 = vpop.f32.mrb[28].mxu0 }
 0x786   :  { %v1940_v9 = vpop.f32.mrb[29].mxu0 }
 0x787   :  { %v1081_v19 = vpop.f32.mrb[30].mxu0 }
 0x788   :  { %v1941_v27 = vpop.f32.mrb[31].mxu0 }
 0x7ab   :  { %v1174_v23 = vpop.f32.mrb[32].mxu0 }
 0x7ac   :  { %v1952_v24 = vpop.f32.mrb[33].mxu0 }
 0x7ad   :  { %v1177_v26 = vpop.f32.mrb[34].mxu0 }
 0x7ae   :  { %v1030_v30 = vpop.f32.mrb[28].mxu1  ;;  %v1953_v31 = vpop.f32.mrb[35].mxu0 }
 0x7af   :  { %v2050_v32 = vpack.i.bf16 %v1078_v18, %v1030_v30  ;;  %v1934_v33 = vpop.f32.mrb[29].mxu1  ;;  %v1748_v30 = vld [vmem:[%s2536_s3 + $0x5] ss:$0 sm:$0xff] }
 0x7b0   :  { %v1033_v34 = vpop.f32.mrb[30].mxu1 }
 0x7b1   :  { %2051 = vrot.lane.b32.xlu0 %v2050_v32, %s2189_s26  ;;  %v1935_v35 = vpop.f32.mrb[31].mxu1 }
 0x7b2   :  { %v2066_v35 = vld [vmem:[#allocation4 + $0x30] sm:$0xff]  }
 0x7b6   :  { %v1126_v36 = vpop.f32.mrb[32].mxu1 }
 0x7b7   :  { %v2055_v37 = vpack.i.bf16 %v1174_v23, %v1126_v36  ;;  %v1946_v38 = vpop.f32.mrb[33].mxu1  ;;  %v1747_v23 = vld [vmem:[%s2536_s3 + $0x4] ss:$0 sm:$0xff]  ;;  %v2067_v36 = vld [vmem:[#allocation4 + $0x38] sm:$0xff]  }
 0x7b8   :  { %v1129_v39 = vpop.f32.mrb[34].mxu1  ;;  %v2069_v38 = vld [vmem:[#allocation4 + $0x48] sm:$0xff]  }
 0x7b9   :  { %2056 = vrot.lane.b32.xlu1 %v2055_v37, %s2190_s29  ;;  %v1947_v40 = vpop.f32.mrb[35].mxu1  ;;  %v2068_v37 = vld [vmem:[#allocation4 + $0x40] sm:$0xff]   ;;  %v1749_v39 = vld [vmem:[%s2536_s3 + $0x6] ss:$0 sm:$0xff] }
 0x7f2   :  { %v2047_v41 = vpop.permute.xlu1 %2046 }
 0x7f3   :  { %v2049_v22 = vunpack.i.h.bf16 %v2047_v41  ;;  %v2048_v43 = vunpack.i.l.bf16 %v2047_v41 }
 0x7f5   :  { %v1205_v48 = vsel %vm301_vm6, %v886_v3, %v2049_v22  ;;  %v1204_v49 = vsel %vm301_vm6, %v838_v62, %v2048_v43 }
 0x823   :  { %v2052_v42 = vpop.permute.xlu0 %2051 }
 0x824   :  { %v2054_v44 = vunpack.i.h.bf16 %v2052_v42  ;;  %v2053_v45 = vunpack.i.l.bf16 %v2052_v42 }
 0x826   :  { %v1208_v50 = vsel %vm1206_vm8, %v1205_v48, %v2054_v44  ;;  %v1207_v51 = vsel %vm1206_vm8, %v1204_v49, %v2053_v45 }
 0x82b   :  { %v2057_v47 = vpop.permute.xlu1 %2056 }
 0x82c   :  { %v2059_v14 = vunpack.i.h.bf16 %v2057_v47  ;;  %v2058_v16 = vunpack.i.l.bf16 %v2057_v47 }
 0x82e   :  { %v1211_v46 = vsel %vm1209_vm9, %v1208_v50, %v2059_v14  ;;  %v1210_v52 = vsel %vm1209_vm9, %v1207_v51, %v2058_v16 }
 0x82f   :  { %v1216_v53 = vpack.c.bf16 %v1211_v46, %v1210_v52 }
 0x831   :  { %1959 = vmatmul.mubr.msk.bf16.vlgmr.msra.gmra.mrb[36].mxu1 %vm225_vm5, %v1216_v53 }
 0x832   :  { %1978 = vmatprep.mubr.msk.bf16.mxu1 %vm2184_vm4, %v2183_v1  ;;  %1971 = vmatpush3.bf16.msra.mxu1 %v2066_v35 }
 0x833   :  { %1972 = vmatprep.subr.bf16.mxu1 %v2183_v1 }
 0x836   :  { %1973 = vmatpush3.bf16.msra.mxu1 %v2067_v36 }
 0x837   :  { %1974 = vmatprep.subr.bf16.mxu1 %v2183_v1 }
 0x83a   :  { %1975 = vmatpush3.bf16.msra.mxu1 %v2068_v37  ;;  %v1753_v37 = vld [vmem:[%s2536_s3 + $0x7] ss:$0 sm:$0xff] }
 0x83b   :  { %1976 = vmatprep.subr.bf16.mxu1 %v2183_v1 }
 0x83e   :  { %1977 = vmatpush3.bf16.msra.mxu1 %v2069_v38 }
 0x904   :  { %v1271_v55 = vpop.f32.mrb[36].mxu1 }
 0x905   :  { %v1272_v56 = vadd.f32 %v1743_v54, %v1271_v55  ;;  %v1960_v57 = vpop.f32.mrb[37].mxu1 }
 0x906   :  { %v1274_v61 = vpop.f32.mrb[38].mxu1 }
 0x907   :  { %v1278_v21 = vadd.f32 %v1272_v56, %v2274_v59  ;;  %v1275_v58 = vadd.f32 %v1743_v54, %v1274_v61  ;;  %v1961_v62 = vpop.f32.mrb[39].mxu1 }
 0x909   :  { %v1279_v63 = vadd.f32 %v1275_v58, %v2276_v60  ;;  %v1282_v0 = vmul.f32 %v2256_v28, %v1278_v21  ;;  %v2064_v60 = vld [vmem:[#allocation4 + $0x20] sm:$0xff]  }
 0x90a   :  { %1963 = vmatpush3.bf16.msra.mxu0 %v2064_v60 }
 0x90b   :  { %1284 = vadd.xlane.f32.xlu0 %v1282_v0  ;;  %v1283_v2 = vmul.f32 %v2256_v28, %v1279_v63  ;;  %1964 = vmatprep.subr.bf16.mxu0 %v2183_v1 }
 0x90d   :  { %1286 = vadd.xlane.f32.xlu1 %v1283_v2 }
 0x90e   :  { %1965 = vmatpush3.bf16.msra.mxu0 %v2065_v13 }
 0x90f   :  { %1982 = vmatprep.subr.bf16.mxu0 %v2183_v1 }
 0x998   :  { %v1285_v3 = vpop.xlane.xlu0 %1284 }
 0x999   :  { %v1288_v4 = vmul.f32 0.03125, %v1285_v3 }
 0x99a   :  { %v1287_v5 = vpop.xlane.xlu1 %1286 }
 0x99b   :  { %v1290_v6 = vsub.f32 %v1282_v0, %v1288_v4  ;;  %v1289_v7 = vmul.f32 0.03125, %v1287_v5 }
 0x99d   :  { %v1291_v8 = vsub.f32 %v1283_v2, %v1289_v7  ;;  %v1292_v10 = vmul.f32 %v2256_v28, %v1290_v6 }
 0x99f   :  { %v1294_v11 = vmul.f32 %v1292_v10, %v1292_v10  ;;  %v1293_v59 = vmul.f32 %v2256_v28, %v1291_v8 }
 0x9a1   :  { %1296 = vadd.xlane.f32.xlu0 %v1294_v11  ;;  %v1295_v12 = vmul.f32 %v1293_v59, %v1293_v59 }
 0x9a5   :  { %1298 = vadd.xlane.f32.xlu0 %v1295_v12 }
 0xa2e   :  { %v1297_v15 = vpop.xlane.xlu0 %1296 }
 0xa2f   :  { %v1300_v17 = vmul.f32 0.03125, %v1297_v15 }
 0xa31   :  { %v1302_v25 = vadd.f32 1e-12, %v1300_v17 }
 0xa32   :  { %v1299_v18 = vpop.xlane.xlu0 %1298 }
 0xa33   :  { %2110 = vrsqrt.f32 %v1302_v25  ;;  %v1301_v9 = vmul.f32 0.03125, %v1299_v18 }
 0xa35   :  { %v1303_v19 = vadd.f32 1e-12, %v1301_v9 }
 0xa37   :  { %2112 = vrsqrt.f32 %v1303_v19 }
 0xa3d   :  { %v2111_v27 = vpop.eup %2110 }
 0xa3e   :  { %v1306_v20 = vmul.f32 %v2111_v27, %v1292_v10 }
 0xa40   :  { %v1312_v26 = vmul.f32 %v1747_v23, %v1306_v20 }
 0xa41   :  { %v2113_v24 = vpop.eup %2112 }
 0xa42   :  { %v1307_v29 = vmul.f32 %v2113_v24, %v1293_v59  ;;  %v2485_v32 = vadd.f32 %v1748_v30, %v1312_v26 }
 0xa44   :  { %v1313_v31 = vmul.f32 %v1747_v23, %v1307_v29 }
 0xa46   :  { %v2487_v33 = vadd.f32 %v1748_v30, %v1313_v31 }
 0xa48   :  { %v1324_v34 = vpack.c.bf16 %v2487_v33, %v2485_v32 }
 0xa4a   :  { %1967 = vmatmul.mubr.msk.bf16.vlgmr.msra.gmra.mrb[36].mxu0 %vm225_vm5, %v1324_v34 }
 0xa4b   :  { %1986 = vmatprep.mubr.msk.bf16.mxu0 %vm2184_vm4, %v2183_v1 }
 0xb1d   :  { %v1379_v40 = vpop.f32.mrb[36].mxu0 }
 0xb1e   :  { %v1380_v41 = vadd.f32 %v1749_v39, %v1379_v40  ;;  %v1968_v42 = vpop.f32.mrb[37].mxu0 }
 0xb1f   :  { %v1382_v22 = vpop.f32.mrb[38].mxu0 }
 0xb20   :  { %v1388_v43 = vmul.f32 0.70710677, %v1380_v41  ;;  %v1383_v44 = vadd.f32 %v1749_v39, %v1382_v22  ;;  %v1969_v45 = vpop.f32.mrb[39].mxu0  ;;  %v1386_v29 = vmul.f32 0.5, %v1380_v41 }
 0xb22   :  { %v1390_v47 = vand.u32 2147483647, %v1388_v43  ;;  %v1389_v48 = vmul.f32 0.70710677, %v1383_v44  ;;  %vm1428_vm10 = vcmp.ge.f32.partialorder %v1388_v43, 0.0  ;;  %v1387_v30 = vmul.f32 0.5, %v1383_v44 }
 0xb24   :  { %v1392_v49 = vmul.f32 0.3275911, %v1390_v47  ;;  %v1391_v14 = vand.u32 2147483647, %v1389_v48  ;;  %v1416_v46 = vsub.f32 0.0, %v1390_v47  ;;  %vm1429_vm11 = vcmp.ge.f32.partialorder %v1389_v48, 0.0 }
 0xb26   :  { %v1394_v16 = vadd.f32 1.0, %v1392_v49  ;;  %v1393_v50 = vmul.f32 0.3275911, %v1391_v14  ;;  %v1417_v52 = vsub.f32 0.0, %v1391_v14  ;;  %v1418_v54 = vmul.f32 %v1416_v46, %v1390_v47 }
 0xb28   :  { %2114 = vrcp.f32 %v1394_v16  ;;  %v1395_v51 = vadd.f32 1.0, %v1393_v50  ;;  %v1419_v61 = vmul.f32 %v1417_v52, %v1391_v14  ;;  %v1420_v21 = vmul.f32 1.442695, %v1418_v54  ;;  %v2071_v54 = vld [vmem:[#allocation4 + $0x58] sm:$0xff]  }
 0xb2a   :  { %2116 = vrcp.f32 %v1395_v51  ;;  %v1422_v2 = vmul.f32 1.442695, %v1419_v61 }
 0xb2b   :  { %2118 = vpow2.f32 %v1420_v21 }
 0xb2c   :  { %2120 = vpow2.f32 %v1422_v2  ;;  %v1760_v2 = vld [vmem:[%s2536_s3 + $0x9] ss:$0 sm:$0xff] }
 0xb32   :  { %v2115_v53 = vpop.eup %2114 }
 0xb33   :  { %v1398_v55 = vmul.f32 1.0614054, %v2115_v53 }
 0xb34   :  { %v2117_v56 = vpop.eup %2116 }
 0xb35   :  { %v1400_v57 = vadd.f32 -1.4531521, %v1398_v55  ;;  %v1399_v58 = vmul.f32 1.0614054, %v2117_v56  ;;  %v2119_v60 = vpop.eup %2118 }
 0xb36   :  { %v2121_v25 = vpop.eup %2120 }
 0xb37   :  { %v1402_v62 = vmul.f32 %v2115_v53, %v1400_v57  ;;  %v1401_v63 = vadd.f32 -1.4531521, %v1399_v58 }
 0xb39   :  { %v1404_v0 = vadd.f32 1.4214138, %v1402_v62  ;;  %v1403_v3 = vmul.f32 %v2117_v56, %v1401_v63  ;;  %v1759_v62 = vld [vmem:[%s2536_s3 + $0x8] ss:$0 sm:$0xff] }
 0xb3b   :  { %v1406_v4 = vmul.f32 %v2115_v53, %v1404_v0  ;;  %v1405_v5 = vadd.f32 1.4214138, %v1403_v3 }
 0xb3d   :  { %v1408_v6 = vadd.f32 -0.28449672, %v1406_v4  ;;  %v1407_v7 = vmul.f32 %v2117_v56, %v1405_v5 }
 0xb3f   :  { %v1410_v8 = vmul.f32 %v2115_v53, %v1408_v6  ;;  %v1409_v10 = vadd.f32 -0.28449672, %v1407_v7 }
 0xb41   :  { %v1412_v11 = vadd.f32 0.2548296, %v1410_v8  ;;  %v1411_v59 = vmul.f32 %v2117_v56, %v1409_v10 }
 0xb43   :  { %v1414_v12 = vmul.f32 %v2115_v53, %v1412_v11  ;;  %v1413_v13 = vadd.f32 0.2548296, %v1411_v59 }
 0xb45   :  { %v1424_v15 = vmul.f32 %v2119_v60, %v1414_v12  ;;  %v1415_v17 = vmul.f32 %v2117_v56, %v1413_v13 }
 0xb47   :  { %v1426_v18 = vsub.f32 1.0, %v1424_v15  ;;  %v1425_v9 = vmul.f32 %v2121_v25, %v1415_v17  ;;  %v2072_v15 = vld [vmem:[#allocation4 + $0x60] sm:$0xff]   ;;  %v2073_v17 = vld [vmem:[#allocation4 + $0x68] sm:$0xff]   ;;  %v1761_v25 = vld [vmem:[%s2536_s3 + $0xa] ss:$0 sm:$0xff] }
 0xb49   :  { %v1430_v19 = vsub.f32 0.0, %v1426_v18  ;;  %v1427_v27 = vsub.f32 1.0, %v1425_v9 }
 0xb4b   :  { %v1432_v20 = vsel %vm1428_vm10, %v1426_v18, %v1430_v19  ;;  %v1431_v23 = vsub.f32 0.0, %v1427_v27 }
 0xb4c   :  { %v1434_v24 = vadd.f32 1.0, %v1432_v20 }
 0xb4d   :  { %v1433_v26 = vsel %vm1429_vm11, %v1427_v27, %v1431_v23 }
 0xb4e   :  { %v1435_v31 = vadd.f32 1.0, %v1433_v26  ;;  %v1436_v34 = vmul.f32 %v1434_v24, %v1386_v29  ;;  %v1765_v26 = vld [vmem:[%s2536_s3 + $0xb] ss:$0 sm:$0xff] }
 0xb50   :  { %v1437_v35 = vmul.f32 %v1435_v31, %v1387_v30 }
 0xb52   :  { %v1446_v36 = vpack.c.bf16 %v1437_v35, %v1436_v34 }
 0xb54   :  { %1979 = vmatmul.mubr.msk.bf16.vlgmr.msra.gmra.mrb[40].mxu1 %vm74_vm0, %v1446_v36 }
 0xc27   :  { %v1513_v38 = vpop.f32.mrb[40].mxu1 }
 0xc28   :  { %v1514_v39 = vadd.f32 %v1753_v37, %v1513_v38  ;;  %v1980_v40 = vpop.f32.mrb[41].mxu1 }
 0xc29   :  { %v1516_v42 = vpop.f32.mrb[42].mxu1 }
 0xc2a   :  { %v1520_v22 = vadd.f32 %v1514_v39, %v2485_v32  ;;  %v1517_v43 = vadd.f32 %v1753_v37, %v1516_v42  ;;  %v1981_v45 = vpop.f32.mrb[43].mxu1 }
 0xc2c   :  { %v1521_v41 = vadd.f32 %v1517_v43, %v2487_v33  ;;  %v1524_v44 = vmul.f32 %v2256_v28, %v1520_v22  ;;  %v2070_v33 = vld [vmem:[#allocation4 + $0x50] sm:$0xff]  }
 0xc2d   :  { %1983 = vmatpush3.bf16.msra.mxu0 %v2070_v33 }
 0xc2e   :  { %1526 = vadd.xlane.f32.xlu0 %v1524_v44  ;;  %v1525_v47 = vmul.f32 %v2256_v28, %v1521_v41  ;;  %1984 = vmatprep.subr.bf16.mxu0 %v2183_v1 }
 0xc30   :  { %1528 = vadd.xlane.f32.xlu1 %v1525_v47 }
 0xc31   :  { %1985 = vmatpush3.bf16.msra.mxu0 %v2071_v54 }
 0xc32   :  { %1990 = vmatprep.subr.bf16.mxu0 %v2183_v1 }
 0xcbb   :  { %v1527_v48 = vpop.xlane.xlu0 %1526 }
 0xcbc   :  { %v1530_v49 = vmul.f32 0.03125, %v1527_v48 }
 0xcbd   :  { %v1529_v14 = vpop.xlane.xlu1 %1528 }
 0xcbe   :  { %v1532_v16 = vsub.f32 %v1524_v44, %v1530_v49  ;;  %v1531_v50 = vmul.f32 0.03125, %v1529_v14 }
 0xcc0   :  { %v1533_v51 = vsub.f32 %v1525_v47, %v1531_v50  ;;  %v1534_v46 = vmul.f32 %v2256_v28, %v1532_v16 }
 0xcc2   :  { %v1536_v52 = vmul.f32 %v1534_v46, %v1534_v46  ;;  %v1535_v32 = vmul.f32 %v2256_v28, %v1533_v51 }
 0xcc4   :  { %1538 = vadd.xlane.f32.xlu0 %v1536_v52  ;;  %v1537_v53 = vmul.f32 %v1535_v32, %v1535_v32 }
 0xcc6   :  { %1540 = vadd.xlane.f32.xlu1 %v1537_v53 }
 0xd51   :  { %v1539_v55 = vpop.xlane.xlu0 %1538 }
 0xd52   :  { %v1542_v56 = vmul.f32 0.03125, %v1539_v55 }
 0xd53   :  { %v1541_v57 = vpop.xlane.xlu1 %1540 }
 0xd54   :  { %v1544_v61 = vadd.f32 1e-12, %v1542_v56  ;;  %v1543_v21 = vmul.f32 0.03125, %v1541_v57 }
 0xd56   :  { %2122 = vrsqrt.f32 %v1544_v61  ;;  %v1545_v58 = vadd.f32 1e-12, %v1543_v21 }
 0xd58   :  { %2124 = vrsqrt.f32 %v1545_v58 }
 0xd60   :  { %v2123_v28 = vpop.eup %2122 }
 0xd61   :  { %v1548_v63 = vmul.f32 %v2123_v28, %v1534_v46 }
 0xd62   :  { %v2125_v0 = vpop.eup %2124 }
 0xd63   :  { %v1554_v3 = vmul.f32 %v1759_v62, %v1548_v63  ;;  %v1549_v4 = vmul.f32 %v2125_v0, %v1535_v32 }
 0xd65   :  { %v1560_v5 = vadd.f32 %v1760_v2, %v1554_v3  ;;  %v1555_v6 = vmul.f32 %v1759_v62, %v1549_v4 }
 0xd67   :  { %v1561_v7 = vadd.f32 %v1760_v2, %v1555_v6  ;;  %v1566_v8 = vpack.c.bf16 %v1560_v5, %v1560_v5 }
 0xd69   :  { %v1567_v10 = vpack.c.bf16 %v1561_v7, %v1561_v7  ;;  %v1575_v59 = vunpack.c.l.b16 %v1566_v8 }
 0xd6b   :  { %v1576_v11 = vunpack.c.l.b16 %v1567_v10 }
 0xd6d   :  { %v1577_v12 = vrot.slane %v1576_v11, 7 }
 0xd6f   :  { %v1579_v60 = vsel %vm1578_vm12, %v1577_v12, %v1575_v59 }
 0xd70   :  { %v1580_v13 = vpack.c.b16 %v1579_v60, %v1579_v60 }
 0xd72   :  { %1987 = vmatmul.mubr.msk.bf16.vlgmr.msra.gmra.mrb[40].mxu0 %vm225_vm5, %v1580_v13 }
 0xd73   :  { %1994 = vmatprep.mubr.msk.bf16.mxu0 %vm2184_vm4, %v2183_v1  ;;  %1991 = vmatpush3.bf16.msra.mxu0 %v2072_v15 }
 0xd74   :  { %1992 = vmatprep.subr.bf16.mxu0 %v2183_v1 }
 0xd77   :  { %1993 = vmatpush3.bf16.msra.mxu0 %v2073_v17 }
 0xe45   :  { %v1630_v18 = vpop.f32.mrb[40].mxu0 }
 0xe46   :  { %v1631_v9 = vadd.f32 %v1761_v25, %v1630_v18  ;;  %v1988_v19 = vpop.f32.mrb[41].mxu0 }
 0xe47   :  { %v1633_v27 = vpop.f32.mrb[42].mxu0 }
 0xe48   :  { %2126 = vtanh.f32 %v1631_v9  ;;  %v1989_v20 = vpop.f32.mrb[43].mxu0 }
 0xe52   :  { %v2127_v23 = vpop.eup %2126 }
 0xe53   :  { %v1641_v24 = vpack.c.bf16 %v2127_v23, %v2127_v23  ;;  %v1703_v30 = vrot.slane %v2127_v23, 6 }
 0xe55   :  { %1995 = vmatmul.mubr.msk.bf16.vlgmr.msra.gmra.mrb[44].mxu0 %vm225_vm5, %v1641_v24 }
 0xf28   :  { %v1696_v1 = vpop.f32.mrb[44].mxu0 }
 0xf29   :  { %v1697_v29 = vadd.f32 %v1765_v26, %v1696_v1  ;;  %v1996_v31 = vpop.f32.mrb[45].mxu0 }
 0xf2a   :  { %v1699_v34 = vpop.f32.mrb[46].mxu0 }
 0xf2b   :  { %v1706_v35 = vsel %vm1705_vm13, %v1697_v29, %v1703_v30  ;;  %v1997_v36 = vpop.f32.mrb[47].mxu0 }
 0xf2c   :  { %v1707_v37 = vsel %vm800_vm7, %v1706_v35, 0.0 }
 0xf2d   :  { %1708 = vst [vmem:[%s2537_s4] sm:$0xff] %v1707_v37 }
 0xf2e   :  { %1713 = vsyncpa [#allocation3], 1 }
 0xf2f   :  { %1714 = vsyncpa [#allocation5], 1 }

</bundles_post_ra>
